<compile_context>
chip_gen: v6e
topology: v6e:2x2x1
jax: 0.10.0
libtpu: 0.0.40
codegen_flags: <defaults>
</compile_context>

<pallas_src>
import functools
import numpy as np
import jax
import jax.numpy as jnp
from jax.experimental import pallas as pl
from jax.experimental.pallas import tpu as pltpu

EPS = 1e-5  # torch.nn.LayerNorm default eps


def _layernorm(y, gamma, beta):
    # Single-pass moments (E[x], E[x^2]) instead of mean/center/var.
    mu = jnp.mean(y, axis=-1, keepdims=True)
    ms = jnp.mean(y * y, axis=-1, keepdims=True)
    var = ms - mu * mu
    return (y - mu) * jax.lax.rsqrt(var + EPS) * gamma + beta


def _mxu(a, w):
    # bf16 operands, f32 accumulation on the MXU (w is pre-cast to bf16 host-side).
    return jnp.dot(a.astype(w.dtype), w, preferred_element_type=jnp.float32)


# --------------------------- kernel A: attention + node stream ---------------------------
def _attn_node_kernel(TB, n, D, H,
                      x_ref, e_ref,
                      wqkv_ref, bqkv_ref, mhd_ref, mhdt_ref,
                      woh_ref, boh_ref, woe_ref, boe_ref,
                      wh1_ref, bh1_ref, wh2_ref, bh2_ref,
                      gh1_ref, bth1_ref, gh2_ref, bth2_ref,
                      x_out_ref, pw_out_ref):
    x = x_ref[...]                                     # (TB*n, D)      f32
    E = e_ref[...].reshape(TB, n, n, D)                # (TB, n, n, D)  f32

    # Fused Q/K/V projection: one (TB*n, D) @ (D, 3D) MXU matmul.
    qkv = _mxu(x, wqkv_ref[...]) + bqkv_ref[...]       # (TB*n, 3D) f32
    Q = qkv[:, :D].reshape(TB, n, D)
    K = qkv[:, D:2 * D].reshape(TB, n, D)
    V = qkv[:, 2 * D:].reshape(TB, n, D)

    # Edge-modulated raw scores for all heads at once (VPU):
    #   P[b, i, j, h*d + c] = Q[b, i, h*d+c] * K[b, j, h*d+c] * E[b, i, j, h*d+c]
    P = Q[:, :, None, :] * K[:, None, :, :] * E        # (TB, n, n, D)
    P2 = P.reshape(TB * n * n, D)
    P2b = P2.astype(jnp.bfloat16)

    # All-head logits with ONE MXU matmul against a block-diagonal reduction
    # matrix (1/sqrt(d) already folded in host-side) -- replaces a per-head loop.
    logits = jnp.dot(P2b, mhd_ref[...],
                     preferred_element_type=jnp.float32).reshape(TB, n, n, H)
    m = jnp.max(logits, axis=2, keepdims=True)         # softmax over key axis j
    p = jnp.exp(logits - m)
    s = jnp.sum(p, axis=2, keepdims=True)
    attn = p * pl.reciprocal(s, approx=True)           # EUP divide, (TB, n, n, H)

    # Broadcast head probabilities back to D channels with ONE MXU matmul, then
    # contract the key axis -- fully vectorized over heads (no per-head slices).
    attn_exp = _mxu(attn.reshape(TB * n * n, H),
                    mhdt_ref[...]).reshape(TB, n, n, D)
    atten = jnp.sum(attn_exp * V[:, None, :, :], axis=2).reshape(TB * n, D)

    # ---------------- node stream ----------------
    xo = x + _mxu(atten, woh_ref[...]) + boh_ref[...]
    xo = _layernorm(xo, gh1_ref[...], bth1_ref[...])
    h1 = jnp.maximum(_mxu(xo, wh1_ref[...]) + bh1_ref[...], 0.0)
    xo = xo + _mxu(h1, wh2_ref[...]) + bh2_ref[...]
    xo = _layernorm(xo, gh2_ref[...], bth2_ref[...])
    x_out_ref[...] = xo
    # TODO(synk): with D < 128 these stores are masked partial stores; production
    # embed_dims that are multiples of 128 get lane-dense stores for free.

    # ------- edge projection O_e on UN-transposed scores (project first) -------
    # The single (i <-> j) swap is done once in the wrapper on this projected
    # tensor -- replaces the per-row stack/concat.  Stored bf16 (intermediate).
    pw = jnp.dot(P2b, woe_ref[...],
                 preferred_element_type=jnp.float32) + boe_ref[...]
    pw_out_ref[...] = pw.astype(pw_out_ref.dtype)


# --------------------------- kernel B: edge stream (row-tiled) ---------------------------
def _edge_stream_kernel(e_ref, pw_ref,
                        we1_ref, be1_ref, we2_ref, be2_ref,
                        ge1_ref, bte1_ref, ge2_ref, bte2_ref,
                        out_ref):
    e = e_ref[...] + pw_ref[...].astype(jnp.float32)   # residual + O_e(edges_out)
    e = _layernorm(e, ge1_ref[...], bte1_ref[...])
    e1 = jnp.maximum(_mxu(e, we1_ref[...]) + be1_ref[...], 0.0)
    e = e + _mxu(e1, we2_ref[...]) + be2_ref[...]
    e = _layernorm(e, ge2_ref[...], bte2_ref[...])
    out_ref[...] = e


# --------------------------------- wrapper ---------------------------------
def _pick_tb(B, n, D, budget_bytes=4 << 20):
    """Largest divisor of B whose per-step edge block fits a small VMEM budget."""
    cap = max(1, budget_bytes // max(1, n * n * D * 4))
    tb = 1
    for c in range(1, B + 1):
        if B % c == 0 and c <= cap:
            tb = c
    # Keep block sublane dims legal ((8,128) rule: multiple of 8 or full extent).
    if ((tb * n) % 8 != 0 or (tb * n * n) % 8 != 0) and tb != B:
        tb = B
    return tb


def _pick_block_rows(total, cap):
    """Largest divisor of `total` <= cap whose row count is a multiple of 8 (or full)."""
    for c in range(min(total, cap), 0, -1):
        if total % c == 0 and (c % 8 == 0 or c == total):
            return c
    return total


def transformer_layer(nodes, edges, params, head_num):
    B, n, D = nodes.shape
    H = head_num
    assert D % H == 0
    d = D // H
    f32, bf16 = jnp.float32, jnp.bfloat16

    # ---- host-side parameter packing ----
    wqkv = jnp.concatenate([params["wq"], params["wk"], params["wv"]], axis=1).astype(bf16)
    bqkv = jnp.concatenate([params["bq"], params["bk"], params["bv"]], axis=1).astype(f32)
    # Block-diagonal head-sum matrix (with 1/sqrt(d) folded in) and head-expand matrix.
    mhd_np = np.zeros((D, H), np.float32)
    for h in range(H):
        mhd_np[h * d:(h + 1) * d, h] = 1.0 / np.sqrt(d)
    mhd = jnp.asarray(mhd_np).astype(bf16)                                  # (D, H)
    mhdt = jnp.asarray((mhd_np > 0).astype(np.float32).T).astype(bf16)      # (H, D), ones

    a_params = [wqkv, bqkv, mhd, mhdt,
                params["woh"].astype(bf16), params["boh"].astype(f32),
                params["woe"].astype(bf16), params["boe"].astype(f32),
                params["wh1"].astype(bf16), params["bh1"].astype(f32),
                params["wh2"].astype(bf16), params["bh2"].astype(f32),
                params["gh1"].astype(f32), params["bth1"].astype(f32),
                params["gh2"].astype(f32), params["bth2"].astype(f32)]
    b_params = [params["we1"].astype(bf16), params["be1"].astype(f32),
                params["we2"].astype(bf16), params["be2"].astype(f32),
                params["ge1"].astype(f32), params["bte1"].astype(f32),
                params["ge2"].astype(f32), params["bte2"].astype(f32)]

    nodes2d = nodes.reshape(B * n, D).astype(f32)
    edges2d = edges.reshape(B * n * n, D).astype(f32)

    def full_spec(a):
        nd = a.ndim
        return pl.BlockSpec(a.shape, lambda b, _nd=nd: (0,) * _nd)

    # -------- kernel A: attention + node stream, grid over batch blocks --------
    TB = _pick_tb(B, n, D)
    kernel_a = functools.partial(_attn_node_kernel, TB, n, D, H)
    x2d, pw2d = pl.pallas_call(
        kernel_a,
        out_shape=(jax.ShapeDtypeStruct((B * n, D), f32),
                   jax.ShapeDtypeStruct((B * n * n, D), bf16)),
        grid=(B // TB,),
        in_specs=[pl.BlockSpec((TB * n, D), lambda b: (b, 0)),
                  pl.BlockSpec((TB * n * n, D), lambda b: (b, 0))]
                 + [full_spec(a) for a in a_params],
        out_specs=(pl.BlockSpec((TB * n, D), lambda b: (b, 0)),
                   pl.BlockSpec((TB * n * n, D), lambda b: (b, 0))),
        compiler_params=pltpu.CompilerParams(
            dimension_semantics=("parallel",),
            vmem_limit_bytes=48 * 1024 * 1024),   # safe on v7x (64 MiB physical)
    )(nodes2d, edges2d, *a_params)

    # Single (i <-> j) swap of the already-projected scores, done wrapper-side
    # (pure layout plumbing) -- replaces the old per-row stack/concat.
    pwT2d = jnp.swapaxes(pw2d.reshape(B, n, n, D), 1, 2).reshape(B * n * n, D)

    # -------- kernel B: edge stream, tiled over the flattened n^2 rows --------
    total_rows = B * n * n
    cap_rows = max(8, (2 << 20) // max(1, D * 4))          # ~2 MiB per input block
    TR = _pick_block_rows(total_rows, min(cap_rows, 2048))
    e2d = pl.pallas_call(
        _edge_stream_kernel,
        out_shape=jax.ShapeDtypeStruct((total_rows, D), f32),
        grid=(total_rows // TR,),
        in_specs=[pl.BlockSpec((TR, D), lambda r: (r, 0)),
                  pl.BlockSpec((TR, D), lambda r: (r, 0))]
                 + [full_spec(a) for a in b_params],
        out_specs=pl.BlockSpec((TR, D), lambda r: (r, 0)),
        compiler_params=pltpu.CompilerParams(
            dimension_semantics=("parallel",),
            vmem_limit_bytes=32 * 1024 * 1024),
    )(edges2d, pwT2d, *b_params)

    return x2d.reshape(B, n, D), e2d.reshape(B, n, n, D)


# ---------------- pure-JAX reference (mirrors the PyTorch forward) ----------------
def ref_forward(nodes, edges, p, head_num):
    B, n, D = nodes.shape
    d = D // head_num

    def lin(x, w, b):
        return x @ w + b

    Q = (lin(nodes, p["wq"], p["bq"])).reshape(B, n, head_num, d).transpose(0, 2, 1, 3)
    K = (lin(nodes, p["wk"], p["bk"])).reshape(B, n, head_num, d).transpose(0, 2, 1, 3)
    V = (lin(nodes, p["wv"], p["bv"])).reshape(B, n, head_num, d).transpose(0, 2, 1, 3)
    edges_in = edges.reshape(B, n, n, head_num, d).transpose(0, 3, 1, 2, 4)

    scores = Q[:, :, :, None, :] * K[:, :, None, :, :] * edges_in     # (B,H,n,n,d)
    logits = scores.sum(-1) / np.sqrt(d)
    attn = jax.nn.softmax(logits, axis=3)
    out = jnp.einsum("bhij,bhjd->bhid", attn, V)
    atten = out.transpose(0, 2, 1, 3).reshape(B, n, D)
    edges_out = jnp.transpose(scores, (0, 3, 2, 1, 4)).reshape(B, n, n, D)

    x = nodes + lin(atten, p["woh"], p["boh"])
    e = edges + lin(edges_out, p["woe"], p["boe"])
    x = _layernorm(x, p["gh1"], p["bth1"])
    e = _layernorm(e, p["ge1"], p["bte1"])
    x = x + lin(jax.nn.relu(lin(x, p["wh1"], p["bh1"])), p["wh2"], p["bh2"])
    e = e + lin(jax.nn.relu(lin(e, p["we1"], p["be1"])), p["we2"], p["be2"])
    x = _layernorm(x, p["gh2"], p["bth2"])
    e = _layernorm(e, p["ge2"], p["bte2"])
    return x, e


def make_params(key, D):
    keys = jax.random.split(key, 24)

    def w(k, shape, s=0.08):
        return jax.random.normal(k, shape, jnp.float32) * s

    p = {}
    p["wq"], p["bq"] = w(keys[0], (D, D)), w(keys[1], (1, D))
    p["wk"], p["bk"] = w(keys[2], (D, D)), w(keys[3], (1, D))
    p["wv"], p["bv"] = w(keys[4], (D, D)), w(keys[5], (1, D))
    p["woh"], p["boh"] = w(keys[6], (D, D)), w(keys[7], (1, D))
    p["woe"], p["boe"] = w(keys[8], (D, D)), w(keys[9], (1, D))
    p["wh1"], p["bh1"] = w(keys[10], (D, 2 * D)), w(keys[11], (1, 2 * D))
    p["wh2"], p["bh2"] = w(keys[12], (2 * D, D)), w(keys[13], (1, D))
    p["we1"], p["be1"] = w(keys[14], (D, D)), w(keys[15], (1, D))
    p["we2"], p["be2"] = w(keys[16], (D, D)), w(keys[17], (1, D))
    p["gh1"], p["bth1"] = 1.0 + w(keys[18], (1, D), 0.05), w(keys[19], (1, D), 0.05)
    p["gh2"], p["bth2"] = 1.0 + w(keys[20], (1, D), 0.05), w(keys[21], (1, D), 0.05)
    p["ge1"], p["bte1"] = 1.0 + w(keys[22], (1, D), 0.05), w(keys[23], (1, D), 0.05)
    p["ge2"], p["bte2"] = jnp.ones((1, D), jnp.float32), jnp.zeros((1, D), jnp.float32)
    return p


if __name__ == "__main__":
    B, n, D, H = 2, 8, 32, 4      # batch, nodes, embed_dim, head_num (D % H == 0)
    key = jax.random.PRNGKey(0)
    k_nodes, k_edges, k_params = jax.random.split(key, 3)
    nodes = jax.random.normal(k_nodes, (B, n, D), jnp.float32)
    edges = jax.random.normal(k_edges, (B, n, n, D), jnp.float32)
    params = make_params(k_params, D)

    x_out, e_out = transformer_layer(nodes, edges, params, H)
    jax.block_until_ready((x_out, e_out))

    x_ref, e_ref = ref_forward(nodes, edges, params, H)
    # bf16 MXU operands + approximate softmax reciprocal -> bf16-class tolerance
    # against the f32 reference.
    assert jnp.allclose(x_out, x_ref, rtol=2e-2, atol=2e-2), float(jnp.max(jnp.abs(x_out - x_ref)))
    assert jnp.allclose(e_out, e_ref, rtol=2e-2, atol=2e-2), float(jnp.max(jnp.abs(e_out - e_ref)))
    # TODO(synk): dropout (args.dropout) and the batchnorm norm_type branch are not
    # implemented (eval-mode, layernorm path only).
    print("KERNEL_OK")
</pallas_src>

<mosaic_0001>
module attributes {stable_mosaic.version = 11 : i64} {
  func.func @_attn_node_kernel(%arg0: i32, %arg1: memref<16x32xf32, #tpu.memory_space<vmem>>, %arg2: memref<128x32xf32, #tpu.memory_space<vmem>>, %arg3: memref<32x96xbf16, #tpu.memory_space<vmem>>, %arg4: memref<1x96xf32, #tpu.memory_space<vmem>>, %arg5: memref<32x4xbf16, #tpu.memory_space<vmem>>, %arg6: memref<4x32xbf16, #tpu.memory_space<vmem>>, %arg7: memref<32x32xbf16, #tpu.memory_space<vmem>>, %arg8: memref<1x32xf32, #tpu.memory_space<vmem>>, %arg9: memref<32x32xbf16, #tpu.memory_space<vmem>>, %arg10: memref<1x32xf32, #tpu.memory_space<vmem>>, %arg11: memref<32x64xbf16, #tpu.memory_space<vmem>>, %arg12: memref<1x64xf32, #tpu.memory_space<vmem>>, %arg13: memref<64x32xbf16, #tpu.memory_space<vmem>>, %arg14: memref<1x32xf32, #tpu.memory_space<vmem>>, %arg15: memref<1x32xf32, #tpu.memory_space<vmem>>, %arg16: memref<1x32xf32, #tpu.memory_space<vmem>>, %arg17: memref<1x32xf32, #tpu.memory_space<vmem>>, %arg18: memref<1x32xf32, #tpu.memory_space<vmem>>, %arg19: memref<16x32xf32, #tpu.memory_space<vmem>>, %arg20: memref<128x32xbf16, #tpu.memory_space<vmem>>) attributes {dimension_semantics = [#tpu.dimension_semantics<parallel>], iteration_bounds = array<i64: 1>, scalar_prefetch = 0 : i64, scratch_operands = 0 : i64, tpu.core_type = #tpu.core_type<tc>, window_params = [{transform_indices = @transform_0, window_bounds = array<i64: 16, 32>}, {transform_indices = @transform_1, window_bounds = array<i64: 128, 32>}, {pipeline_mode = #tpu.pipeline_mode<synchronous>, transform_indices = @transform_2, window_bounds = array<i64: 32, 96>}, {pipeline_mode = #tpu.pipeline_mode<synchronous>, transform_indices = @transform_3, window_bounds = array<i64: 1, 96>}, {pipeline_mode = #tpu.pipeline_mode<synchronous>, transform_indices = @transform_4, window_bounds = array<i64: 32, 4>}, {pipeline_mode = #tpu.pipeline_mode<synchronous>, transform_indices = @transform_5, window_bounds = array<i64: 4, 32>}, {pipeline_mode = #tpu.pipeline_mode<synchronous>, transform_indices = @transform_6, window_bounds = array<i64: 32, 32>}, {pipeline_mode = #tpu.pipeline_mode<synchronous>, transform_indices = @transform_7, window_bounds = array<i64: 1, 32>}, {pipeline_mode = #tpu.pipeline_mode<synchronous>, transform_indices = @transform_8, window_bounds = array<i64: 32, 32>}, {pipeline_mode = #tpu.pipeline_mode<synchronous>, transform_indices = @transform_9, window_bounds = array<i64: 1, 32>}, {pipeline_mode = #tpu.pipeline_mode<synchronous>, transform_indices = @transform_10, window_bounds = array<i64: 32, 64>}, {pipeline_mode = #tpu.pipeline_mode<synchronous>, transform_indices = @transform_11, window_bounds = array<i64: 1, 64>}, {pipeline_mode = #tpu.pipeline_mode<synchronous>, transform_indices = @transform_12, window_bounds = array<i64: 64, 32>}, {pipeline_mode = #tpu.pipeline_mode<synchronous>, transform_indices = @transform_13, window_bounds = array<i64: 1, 32>}, {pipeline_mode = #tpu.pipeline_mode<synchronous>, transform_indices = @transform_14, window_bounds = array<i64: 1, 32>}, {pipeline_mode = #tpu.pipeline_mode<synchronous>, transform_indices = @transform_15, window_bounds = array<i64: 1, 32>}, {pipeline_mode = #tpu.pipeline_mode<synchronous>, transform_indices = @transform_16, window_bounds = array<i64: 1, 32>}, {pipeline_mode = #tpu.pipeline_mode<synchronous>, transform_indices = @transform_17, window_bounds = array<i64: 1, 32>}, {transform_indices = @transform_18, window_bounds = array<i64: 16, 32>}, {transform_indices = @transform_19, window_bounds = array<i64: 128, 32>}]} {
    %c0 = arith.constant 0 : index
    %c0_0 = arith.constant 0 : index
    %0 = vector.load %arg1[%c0, %c0_0] : memref<16x32xf32, #tpu.memory_space<vmem>>, vector<16x32xf32>
    %c0_1 = arith.constant 0 : index
    %c0_2 = arith.constant 0 : index
    %1 = vector.load %arg2[%c0_1, %c0_2] : memref<128x32xf32, #tpu.memory_space<vmem>>, vector<128x32xf32>
    %2 = vector.shape_cast %1 : vector<128x32xf32> to vector<2x8x8x32xf32>
    %c0_3 = arith.constant 0 : index
    %c0_4 = arith.constant 0 : index
    %3 = vector.load %arg3[%c0_3, %c0_4] : memref<32x96xbf16, #tpu.memory_space<vmem>>, vector<32x96xbf16>
    %4 = arith.truncf %0 : vector<16x32xf32> to vector<16x32xbf16>
    %cst = arith.constant dense<0.000000e+00> : vector<16x96xf32>
    %5 = tpu.matmul %4, %3, %cst {dimension_numbers = #tpu.dot_dimension_numbers<[1], [0], [0], [1], [0, 0, 1, 1], [], []>} : vector<16x32xbf16>, vector<32x96xbf16>, vector<16x96xf32> -> vector<16x96xf32>
    %c0_5 = arith.constant 0 : index
    %c0_6 = arith.constant 0 : index
    %6 = vector.load %arg4[%c0_5, %c0_6] : memref<1x96xf32, #tpu.memory_space<vmem>>, vector<1x96xf32>
    %7 = vector.broadcast %6 : vector<1x96xf32> to vector<16x96xf32>
    %8 = arith.addf %5, %7 : vector<16x96xf32>
    %9 = vector.extract_strided_slice %8 {offsets = [0, 0], sizes = [16, 32], strides = [1, 1]} : vector<16x96xf32> to vector<16x32xf32>
    %10 = vector.shape_cast %9 : vector<16x32xf32> to vector<2x8x32xf32>
    %11 = vector.extract_strided_slice %8 {offsets = [0, 32], sizes = [16, 32], strides = [1, 1]} : vector<16x96xf32> to vector<16x32xf32>
    %12 = vector.shape_cast %11 : vector<16x32xf32> to vector<2x8x32xf32>
    %13 = vector.extract_strided_slice %8 {offsets = [0, 64], sizes = [16, 32], strides = [1, 1]} : vector<16x96xf32> to vector<16x32xf32>
    %14 = vector.shape_cast %13 : vector<16x32xf32> to vector<2x8x32xf32>
    %15 = vector.shape_cast %10 : vector<2x8x32xf32> to vector<2x8x1x32xf32>
    %16 = vector.shape_cast %12 : vector<2x8x32xf32> to vector<2x1x8x32xf32>
    %17 = vector.broadcast %15 : vector<2x8x1x32xf32> to vector<2x8x8x32xf32>
    %18 = vector.broadcast %16 : vector<2x1x8x32xf32> to vector<2x8x8x32xf32>
    %19 = arith.mulf %17, %18 : vector<2x8x8x32xf32>
    %20 = arith.mulf %19, %2 : vector<2x8x8x32xf32>
    %21 = vector.shape_cast %20 : vector<2x8x8x32xf32> to vector<128x32xf32>
    %22 = arith.truncf %21 : vector<128x32xf32> to vector<128x32xbf16>
    %c0_7 = arith.constant 0 : index
    %c0_8 = arith.constant 0 : index
    %23 = vector.load %arg5[%c0_7, %c0_8] : memref<32x4xbf16, #tpu.memory_space<vmem>>, vector<32x4xbf16>
    %cst_9 = arith.constant dense<0.000000e+00> : vector<128x4xf32>
    %24 = tpu.matmul %22, %23, %cst_9 {dimension_numbers = #tpu.dot_dimension_numbers<[1], [0], [0], [1], [0, 0, 1, 1], [], []>} : vector<128x32xbf16>, vector<32x4xbf16>, vector<128x4xf32> -> vector<128x4xf32>
    %25 = vector.shape_cast %24 : vector<128x4xf32> to vector<2x8x8x4xf32>
    %cst_10 = arith.constant dense<0xFF800000> : vector<2x8x4xf32>
    %26 = vector.multi_reduction <maximumf>, %25, %cst_10 [2] : vector<2x8x8x4xf32> to vector<2x8x4xf32>
    %27 = vector.shape_cast %26 : vector<2x8x4xf32> to vector<2x8x1x4xf32>
    %28 = vector.broadcast %27 : vector<2x8x1x4xf32> to vector<2x8x8x4xf32>
    %29 = arith.subf %25, %28 : vector<2x8x8x4xf32>
    %30 = math.exp %29 : vector<2x8x8x4xf32>
    %cst_11 = arith.constant dense<0.000000e+00> : vector<2x8x4xf32>
    %31 = vector.multi_reduction <add>, %30, %cst_11 [2] : vector<2x8x8x4xf32> to vector<2x8x4xf32>
    %32 = vector.shape_cast %31 : vector<2x8x4xf32> to vector<2x8x1x4xf32>
    %33 = tpu.reciprocal %32 {approx = true} : vector<2x8x1x4xf32> -> vector<2x8x1x4xf32>
    %34 = vector.broadcast %33 : vector<2x8x1x4xf32> to vector<2x8x8x4xf32>
    %35 = arith.mulf %30, %34 : vector<2x8x8x4xf32>
    %36 = vector.shape_cast %35 : vector<2x8x8x4xf32> to vector<128x4xf32>
    %c0_12 = arith.constant 0 : index
    %c0_13 = arith.constant 0 : index
    %37 = vector.load %arg6[%c0_12, %c0_13] : memref<4x32xbf16, #tpu.memory_space<vmem>>, vector<4x32xbf16>
    %38 = arith.truncf %36 : vector<128x4xf32> to vector<128x4xbf16>
    %cst_14 = arith.constant dense<0.000000e+00> : vector<128x32xf32>
    %39 = tpu.matmul %38, %37, %cst_14 {dimension_numbers = #tpu.dot_dimension_numbers<[1], [0], [0], [1], [0, 0, 1, 1], [], []>} : vector<128x4xbf16>, vector<4x32xbf16>, vector<128x32xf32> -> vector<128x32xf32>
    %40 = vector.shape_cast %39 : vector<128x32xf32> to vector<2x8x8x32xf32>
    %41 = vector.shape_cast %14 : vector<2x8x32xf32> to vector<2x1x8x32xf32>
    %42 = vector.broadcast %41 : vector<2x1x8x32xf32> to vector<2x8x8x32xf32>
    %43 = arith.mulf %40, %42 : vector<2x8x8x32xf32>
    %cst_15 = arith.constant dense<0.000000e+00> : vector<2x8x32xf32>
    %44 = vector.multi_reduction <add>, %43, %cst_15 [2] : vector<2x8x8x32xf32> to vector<2x8x32xf32>
    %45 = vector.shape_cast %44 : vector<2x8x32xf32> to vector<16x32xf32>
    %c0_16 = arith.constant 0 : index
    %c0_17 = arith.constant 0 : index
    %46 = vector.load %arg7[%c0_16, %c0_17] : memref<32x32xbf16, #tpu.memory_space<vmem>>, vector<32x32xbf16>
    %47 = arith.truncf %45 : vector<16x32xf32> to vector<16x32xbf16>
    %cst_18 = arith.constant dense<0.000000e+00> : vector<16x32xf32>
    %48 = tpu.matmul %47, %46, %cst_18 {dimension_numbers = #tpu.dot_dimension_numbers<[1], [0], [0], [1], [0, 0, 1, 1], [], []>} : vector<16x32xbf16>, vector<32x32xbf16>, vector<16x32xf32> -> vector<16x32xf32>
    %49 = arith.addf %0, %48 : vector<16x32xf32>
    %c0_19 = arith.constant 0 : index
    %c0_20 = arith.constant 0 : index
    %50 = vector.load %arg8[%c0_19, %c0_20] : memref<1x32xf32, #tpu.memory_space<vmem>>, vector<1x32xf32>
    %51 = vector.broadcast %50 : vector<1x32xf32> to vector<16x32xf32>
    %52 = arith.addf %49, %51 : vector<16x32xf32>
    %c0_21 = arith.constant 0 : index
    %c0_22 = arith.constant 0 : index
    %53 = vector.load %arg15[%c0_21, %c0_22] : memref<1x32xf32, #tpu.memory_space<vmem>>, vector<1x32xf32>
    %c0_23 = arith.constant 0 : index
    %c0_24 = arith.constant 0 : index
    %54 = vector.load %arg16[%c0_23, %c0_24] : memref<1x32xf32, #tpu.memory_space<vmem>>, vector<1x32xf32>
    %cst_25 = arith.constant dense<0.000000e+00> : vector<16xf32>
    %55 = vector.multi_reduction <add>, %52, %cst_25 [1] : vector<16x32xf32> to vector<16xf32>
    %56 = vector.shape_cast %55 : vector<16xf32> to vector<16x1xf32>
    %cst_26 = arith.constant 3.200000e+01 : f32
    %57 = vector.broadcast %cst_26 : f32 to vector<16x1xf32>
    %58 = arith.divf %56, %57 : vector<16x1xf32>
    %59 = arith.mulf %52, %52 : vector<16x32xf32>
    %cst_27 = arith.constant dense<0.000000e+00> : vector<16xf32>
    %60 = vector.multi_reduction <add>, %59, %cst_27 [1] : vector<16x32xf32> to vector<16xf32>
    %61 = vector.shape_cast %60 : vector<16xf32> to vector<16x1xf32>
    %cst_28 = arith.constant 3.200000e+01 : f32
    %62 = vector.broadcast %cst_28 : f32 to vector<16x1xf32>
    %63 = arith.divf %61, %62 : vector<16x1xf32>
    %64 = arith.mulf %58, %58 : vector<16x1xf32>
    %65 = arith.subf %63, %64 : vector<16x1xf32>
    %66 = vector.broadcast %58 : vector<16x1xf32> to vector<16x32xf32>
    %67 = arith.subf %52, %66 : vector<16x32xf32>
    %cst_29 = arith.constant 9.99999974E-6 : f32
    %68 = vector.broadcast %cst_29 : f32 to vector<16x1xf32>
    %69 = arith.addf %65, %68 : vector<16x1xf32>
    %70 = math.rsqrt %69 : vector<16x1xf32>
    %71 = vector.broadcast %70 : vector<16x1xf32> to vector<16x32xf32>
    %72 = arith.mulf %67, %71 : vector<16x32xf32>
    %73 = vector.broadcast %53 : vector<1x32xf32> to vector<16x32xf32>
    %74 = arith.mulf %72, %73 : vector<16x32xf32>
    %75 = vector.broadcast %54 : vector<1x32xf32> to vector<16x32xf32>
    %76 = arith.addf %74, %75 : vector<16x32xf32>
    %c0_30 = arith.constant 0 : index
    %c0_31 = arith.constant 0 : index
    %77 = vector.load %arg11[%c0_30, %c0_31] : memref<32x64xbf16, #tpu.memory_space<vmem>>, vector<32x64xbf16>
    %78 = arith.truncf %76 : vector<16x32xf32> to vector<16x32xbf16>
    %cst_32 = arith.constant dense<0.000000e+00> : vector<16x64xf32>
    %79 = tpu.matmul %78, %77, %cst_32 {dimension_numbers = #tpu.dot_dimension_numbers<[1], [0], [0], [1], [0, 0, 1, 1], [], []>} : vector<16x32xbf16>, vector<32x64xbf16>, vector<16x64xf32> -> vector<16x64xf32>
    %c0_33 = arith.constant 0 : index
    %c0_34 = arith.constant 0 : index
    %80 = vector.load %arg12[%c0_33, %c0_34] : memref<1x64xf32, #tpu.memory_space<vmem>>, vector<1x64xf32>
    %81 = vector.broadcast %80 : vector<1x64xf32> to vector<16x64xf32>
    %82 = arith.addf %79, %81 : vector<16x64xf32>
    %cst_35 = arith.constant 0.000000e+00 : f32
    %83 = vector.broadcast %cst_35 : f32 to vector<16x64xf32>
    %84 = arith.maximumf %82, %83 : vector<16x64xf32>
    %c0_36 = arith.constant 0 : index
    %c0_37 = arith.constant 0 : index
    %85 = vector.load %arg13[%c0_36, %c0_37] : memref<64x32xbf16, #tpu.memory_space<vmem>>, vector<64x32xbf16>
    %86 = arith.truncf %84 : vector<16x64xf32> to vector<16x64xbf16>
    %cst_38 = arith.constant dense<0.000000e+00> : vector<16x32xf32>
    %87 = tpu.matmul %86, %85, %cst_38 {dimension_numbers = #tpu.dot_dimension_numbers<[1], [0], [0], [1], [0, 0, 1, 1], [], []>} : vector<16x64xbf16>, vector<64x32xbf16>, vector<16x32xf32> -> vector<16x32xf32>
    %88 = arith.addf %76, %87 : vector<16x32xf32>
    %c0_39 = arith.constant 0 : index
    %c0_40 = arith.constant 0 : index
    %89 = vector.load %arg14[%c0_39, %c0_40] : memref<1x32xf32, #tpu.memory_space<vmem>>, vector<1x32xf32>
    %90 = vector.broadcast %89 : vector<1x32xf32> to vector<16x32xf32>
    %91 = arith.addf %88, %90 : vector<16x32xf32>
    %c0_41 = arith.constant 0 : index
    %c0_42 = arith.constant 0 : index
    %92 = vector.load %arg17[%c0_41, %c0_42] : memref<1x32xf32, #tpu.memory_space<vmem>>, vector<1x32xf32>
    %c0_43 = arith.constant 0 : index
    %c0_44 = arith.constant 0 : index
    %93 = vector.load %arg18[%c0_43, %c0_44] : memref<1x32xf32, #tpu.memory_space<vmem>>, vector<1x32xf32>
    %cst_45 = arith.constant dense<0.000000e+00> : vector<16xf32>
    %94 = vector.multi_reduction <add>, %91, %cst_45 [1] : vector<16x32xf32> to vector<16xf32>
    %95 = vector.shape_cast %94 : vector<16xf32> to vector<16x1xf32>
    %cst_46 = arith.constant 3.200000e+01 : f32
    %96 = vector.broadcast %cst_46 : f32 to vector<16x1xf32>
    %97 = arith.divf %95, %96 : vector<16x1xf32>
    %98 = arith.mulf %91, %91 : vector<16x32xf32>
    %cst_47 = arith.constant dense<0.000000e+00> : vector<16xf32>
    %99 = vector.multi_reduction <add>, %98, %cst_47 [1] : vector<16x32xf32> to vector<16xf32>
    %100 = vector.shape_cast %99 : vector<16xf32> to vector<16x1xf32>
    %cst_48 = arith.constant 3.200000e+01 : f32
    %101 = vector.broadcast %cst_48 : f32 to vector<16x1xf32>
    %102 = arith.divf %100, %101 : vector<16x1xf32>
    %103 = arith.mulf %97, %97 : vector<16x1xf32>
    %104 = arith.subf %102, %103 : vector<16x1xf32>
    %105 = vector.broadcast %97 : vector<16x1xf32> to vector<16x32xf32>
    %106 = arith.subf %91, %105 : vector<16x32xf32>
    %cst_49 = arith.constant 9.99999974E-6 : f32
    %107 = vector.broadcast %cst_49 : f32 to vector<16x1xf32>
    %108 = arith.addf %104, %107 : vector<16x1xf32>
    %109 = math.rsqrt %108 : vector<16x1xf32>
    %110 = vector.broadcast %109 : vector<16x1xf32> to vector<16x32xf32>
    %111 = arith.mulf %106, %110 : vector<16x32xf32>
    %112 = vector.broadcast %92 : vector<1x32xf32> to vector<16x32xf32>
    %113 = arith.mulf %111, %112 : vector<16x32xf32>
    %114 = vector.broadcast %93 : vector<1x32xf32> to vector<16x32xf32>
    %115 = arith.addf %113, %114 : vector<16x32xf32>
    %c0_50 = arith.constant 0 : index
    %c0_51 = arith.constant 0 : index
    %116 = vector.load %arg19[%c0_50, %c0_51] : memref<16x32xf32, #tpu.memory_space<vmem>>, vector<16x32xf32>
    tpu.vector_store %arg19[%c0_50, %c0_51], %115 {strides = array<i32>} : memref<16x32xf32, #tpu.memory_space<vmem>>, vector<16x32xf32>,
    %c0_52 = arith.constant 0 : index
    %c0_53 = arith.constant 0 : index
    %117 = vector.load %arg9[%c0_52, %c0_53] : memref<32x32xbf16, #tpu.memory_space<vmem>>, vector<32x32xbf16>
    %cst_54 = arith.constant dense<0.000000e+00> : vector<128x32xf32>
    %118 = tpu.matmul %22, %117, %cst_54 {dimension_numbers = #tpu.dot_dimension_numbers<[1], [0], [0], [1], [0, 0, 1, 1], [], []>} : vector<128x32xbf16>, vector<32x32xbf16>, vector<128x32xf32> -> vector<128x32xf32>
    %c0_55 = arith.constant 0 : index
    %c0_56 = arith.constant 0 : index
    %119 = vector.load %arg10[%c0_55, %c0_56] : memref<1x32xf32, #tpu.memory_space<vmem>>, vector<1x32xf32>
    %120 = vector.broadcast %119 : vector<1x32xf32> to vector<128x32xf32>
    %121 = arith.addf %118, %120 : vector<128x32xf32>
    %122 = arith.truncf %121 : vector<128x32xf32> to vector<128x32xbf16>
    %c0_57 = arith.constant 0 : index
    %c0_58 = arith.constant 0 : index
    %123 = vector.load %arg20[%c0_57, %c0_58] : memref<128x32xbf16, #tpu.memory_space<vmem>>, vector<128x32xbf16>
    tpu.vector_store %arg20[%c0_57, %c0_58], %122 {strides = array<i32>} : memref<128x32xbf16, #tpu.memory_space<vmem>>, vector<128x32xbf16>,
    return
  }
  func.func @transform_0(%arg0: i32) -> (i32, i32) {
    %c0_i32 = arith.constant 0 : i32
    %c0_i32_0 = arith.constant 0 : i32
    return %arg0, %c0_i32 : i32, i32
  }
  func.func @transform_1(%arg0: i32) -> (i32, i32) {
    %c0_i32 = arith.constant 0 : i32
    %c0_i32_0 = arith.constant 0 : i32
    return %arg0, %c0_i32 : i32, i32
  }
  func.func @transform_2(%arg0: i32) -> (i32, i32) {
    %c0_i32 = arith.constant 0 : i32
    %c0_i32_0 = arith.constant 0 : i32
    %c0_i32_1 = arith.constant 0 : i32
    return %c0_i32, %c0_i32_0 : i32, i32
  }
  func.func @transform_3(%arg0: i32) -> (i32, i32) {
    %c0_i32 = arith.constant 0 : i32
    %c0_i32_0 = arith.constant 0 : i32
    %c0_i32_1 = arith.constant 0 : i32
    return %c0_i32, %c0_i32_0 : i32, i32
  }
  func.func @transform_4(%arg0: i32) -> (i32, i32) {
    %c0_i32 = arith.constant 0 : i32
    %c0_i32_0 = arith.constant 0 : i32
    %c0_i32_1 = arith.constant 0 : i32
    return %c0_i32, %c0_i32_0 : i32, i32
  }
  func.func @transform_5(%arg0: i32) -> (i32, i32) {
    %c0_i32 = arith.constant 0 : i32
    %c0_i32_0 = arith.constant 0 : i32
    %c0_i32_1 = arith.constant 0 : i32
    return %c0_i32, %c0_i32_0 : i32, i32
  }
  func.func @transform_6(%arg0: i32) -> (i32, i32) {
    %c0_i32 = arith.constant 0 : i32
    %c0_i32_0 = arith.constant 0 : i32
    %c0_i32_1 = arith.constant 0 : i32
    return %c0_i32, %c0_i32_0 : i32, i32
  }
  func.func @transform_7(%arg0: i32) -> (i32, i32) {
    %c0_i32 = arith.constant 0 : i32
    %c0_i32_0 = arith.constant 0 : i32
    %c0_i32_1 = arith.constant 0 : i32
    return %c0_i32, %c0_i32_0 : i32, i32
  }
  func.func @transform_8(%arg0: i32) -> (i32, i32) {
    %c0_i32 = arith.constant 0 : i32
    %c0_i32_0 = arith.constant 0 : i32
    %c0_i32_1 = arith.constant 0 : i32
    return %c0_i32, %c0_i32_0 : i32, i32
  }
  func.func @transform_9(%arg0: i32) -> (i32, i32) {
    %c0_i32 = arith.constant 0 : i32
    %c0_i32_0 = arith.constant 0 : i32
    %c0_i32_1 = arith.constant 0 : i32
    return %c0_i32, %c0_i32_0 : i32, i32
  }
  func.func @transform_10(%arg0: i32) -> (i32, i32) {
    %c0_i32 = arith.constant 0 : i32
    %c0_i32_0 = arith.constant 0 : i32
    %c0_i32_1 = arith.constant 0 : i32
    return %c0_i32, %c0_i32_0 : i32, i32
  }
  func.func @transform_11(%arg0: i32) -> (i32, i32) {
    %c0_i32 = arith.constant 0 : i32
    %c0_i32_0 = arith.constant 0 : i32
    %c0_i32_1 = arith.constant 0 : i32
    return %c0_i32, %c0_i32_0 : i32, i32
  }
  func.func @transform_12(%arg0: i32) -> (i32, i32) {
    %c0_i32 = arith.constant 0 : i32
    %c0_i32_0 = arith.constant 0 : i32
    %c0_i32_1 = arith.constant 0 : i32
    return %c0_i32, %c0_i32_0 : i32, i32
  }
  func.func @transform_13(%arg0: i32) -> (i32, i32) {
    %c0_i32 = arith.constant 0 : i32
    %c0_i32_0 = arith.constant 0 : i32
    %c0_i32_1 = arith.constant 0 : i32
    return %c0_i32, %c0_i32_0 : i32, i32
  }
  func.func @transform_14(%arg0: i32) -> (i32, i32) {
    %c0_i32 = arith.constant 0 : i32
    %c0_i32_0 = arith.constant 0 : i32
    %c0_i32_1 = arith.constant 0 : i32
    return %c0_i32, %c0_i32_0 : i32, i32
  }
  func.func @transform_15(%arg0: i32) -> (i32, i32) {
    %c0_i32 = arith.constant 0 : i32
    %c0_i32_0 = arith.constant 0 : i32
    %c0_i32_1 = arith.constant 0 : i32
    return %c0_i32, %c0_i32_0 : i32, i32
  }
  func.func @transform_16(%arg0: i32) -> (i32, i32) {
    %c0_i32 = arith.constant 0 : i32
    %c0_i32_0 = arith.constant 0 : i32
    %c0_i32_1 = arith.constant 0 : i32
    return %c0_i32, %c0_i32_0 : i32, i32
  }
  func.func @transform_17(%arg0: i32) -> (i32, i32) {
    %c0_i32 = arith.constant 0 : i32
    %c0_i32_0 = arith.constant 0 : i32
    %c0_i32_1 = arith.constant 0 : i32
    return %c0_i32, %c0_i32_0 : i32, i32
  }
  func.func @transform_18(%arg0: i32) -> (i32, i32) {
    %c0_i32 = arith.constant 0 : i32
    %c0_i32_0 = arith.constant 0 : i32
    return %arg0, %c0_i32 : i32, i32
  }
  func.func @transform_19(%arg0: i32) -> (i32, i32) {
    %c0_i32 = arith.constant 0 : i32
    %c0_i32_0 = arith.constant 0 : i32
    return %arg0, %c0_i32 : i32, i32
  }
}

</mosaic_0001>

<bundles_post_ra>
// kernel: tpu_custom_call.1
= control target key start
LH: loop header
LB: loop body
LE: loop exit
PB: predicated region body
PF: predicated region fallthrough
CT: control target
= control target key end

     0   :  { %s2683_s0 = inlined_call_operand.vmem [shape: f32[16,32], index: 0, kind: input, shape index: {}]   ;;  %s2684_s1 = inlined_call_operand.vmem [shape: f32[128,32], index: 1, kind: input, shape index: {}]   ;;  %s2685_s2 = inlined_call_operand.vmem [shape: bf16[32,96], index: 2, kind: input, shape index: {}]   ;;  %s2686_s3 = inlined_call_operand.vmem [shape: f32[1,96], index: 3, kind: input, shape index: {}]   ;;  %s2687_s4 = inlined_call_operand.vmem [shape: bf16[32,4], index: 4, kind: input, shape index: {}]   ;;  %s2688_s5 = inlined_call_operand.vmem [shape: bf16[4,32], index: 5, kind: input, shape index: {}]   ;;  %s2689_s6 = inlined_call_operand.vmem [shape: bf16[32,32], index: 6, kind: input, shape index: {}]   ;;  %s2690_s7 = inlined_call_operand.vmem [shape: f32[1,32], index: 7, kind: input, shape index: {}]   ;;  %s2691_s8 = inlined_call_operand.vmem [shape: bf16[32,32], index: 8, kind: input, shape index: {}]   ;;  %s2692_s9 = inlined_call_operand.vmem [shape: f32[1,32], index: 9, kind: input, shape index: {}]   ;;  %s2693_s10 = inlined_call_operand.vmem [shape: bf16[32,64], index: 10, kind: input, shape index: {}]   ;;  %s2694_s11 = inlined_call_operand.vmem [shape: f32[1,64], index: 11, kind: input, shape index: {}]   ;;  %s2695_s12 = inlined_call_operand.vmem [shape: bf16[64,32], index: 12, kind: input, shape index: {}]   ;;  %s2696_s13 = inlined_call_operand.vmem [shape: f32[1,32], index: 13, kind: input, shape index: {}]   ;;  %s2697_s14 = inlined_call_operand.vmem [shape: f32[1,32], index: 14, kind: input, shape index: {}]   ;;  %s2698_s15 = inlined_call_operand.vmem [shape: f32[1,32], index: 15, kind: input, shape index: {}]   ;;  %s2699_s16 = inlined_call_operand.vmem [shape: f32[1,32], index: 16, kind: input, shape index: {}]   ;;  %s2700_s17 = inlined_call_operand.vmem [shape: f32[1,32], index: 17, kind: input, shape index: {}]   ;;  %s2701_s18 = inlined_call_operand.hbm [shape: f32[16,32], index: 18, kind: output, shape index: {0}]   ;;  %s2702_s19 = inlined_call_operand.vmem [shape: bf16[128,32], index: 19, kind: output, shape index: {1}]  }
   0x1   :  { %2706 = sst [smem:[#allocation5_spill]] %s2683_s0 }
   0x2   :  { %2707 = sst [smem:[#allocation6_spill]] %s2684_s1 }
   0x3   :  { %2708 = sst [smem:[#allocation7_spill]] %s2685_s2 }
   0x4   :  { %2709 = sst [smem:[#allocation8_spill]] %s2686_s3 }
   0x5   :  { %s2710_s20 = sld [smem:[#allocation7_spill]]  ;;  %v2045_v1 = vmov 0.0   ;;  %vm2046_vm0 = vmmov 0   ;;  %vm105_vm1 = vcmask 261120  }
   0x6   :  { %1832 = vmatprep.subr.bf16.mxu1 %v2045_v1  ;;  %1836 = vmatprep.mubr.msk.bf16.mxu1 %vm2046_vm0, %v2045_v1  ;;  %s2711_s23 = sld [smem:[#allocation5_spill]] }
   0xb   :  { %v1935_v0 = vld [vmem:[%s2710_s20 + $0x8] sm:$0xff]   ;;  %v1936_v2 = vld [vmem:[%s2710_s20] sm:$0xff]  }
   0xc   :  { %1833 = vmatpush3.bf16.msra.mxu1 %v1935_v0  ;;  %v63_v3 = vld [vmem:[%s2711_s23] sm:$0xff]  ;;  %v64_v4 = vld [vmem:[%s2711_s23 + $0x8] sm:$0xff] }
   0xd   :  { %1834 = vmatprep.subr.bf16.mxu1 %v2045_v1  ;;  %v85_v5 = vpack.c.bf16 %v64_v4, %v63_v3 }
  0x10   :  { %1835 = vmatpush3.bf16.msra.mxu1 %v1936_v2 }
  0x13   :  { %1837 = vmatmul.mubr.msk.bf16.vlgmr.msra.gmra.mxu1 %vm105_vm1, %v85_v5 }
  0x14   :  { %25 = vsyncpa [#allocation3], 0  ;;  %v1937_v6 = vld [vmem:[%s2687_s4 + $0x8] sm:$0xff]   ;;  %v1938_v7 = vld [vmem:[%s2687_s4] sm:$0xff]   ;;  %s2712_s30 = sld [smem:[#allocation8_spill]]  ;;  %s2047_s20 = smov 64   ;;  %v156_v17 = vlaneseq }
  0x15   :  { %1840 = vmatprep.subr.bf16.mxu1 %v1937_v6  ;;  %s2048_s21 = smov 96   ;;  %v2049_v15 = vmov 1966171168   ;;  %s2713_s22 = sld [smem:[#allocation6_spill]]  ;;  %vm851_vm2 = vcmask 1041408   ;;  %vm513_vm3 = vcmask 31744  }
  0x16   :  { %1841 = vmatpush3.bf16.msra.mxu1 %v1937_v6  ;;  %v154_v16 = vunpack.c.l.s4 %v2049_v15  ;;  %v157_v19 = vshrl.u32 %v156_v17, 7  ;;  %vm1138_vm4 = vcmask 1041409   ;;  %vm1140_vm5 = vcmask 1042434  }
  0x17   :  { %1842 = vmatprep.subr.bf16.mxu1 %v1938_v7  ;;  %vm1142_vm6 = vcmask 1043459   ;;  %vm1144_vm7 = vcmask 1044484   ;;  %vm1146_vm8 = vcmask 1045509   ;;  %vm1148_vm9 = vcmask 1046534  }
  0x18   :  { %v155_v18 = vunpack.c.0.s8 %v154_v16  ;;  %v2188_v30 = vsub.s32 0, %v157_v19  ;;  %vm1150_vm10 = vcmask 1047559   ;;  %vm1379_vm11 = vcmask 523264  }
  0x19   :  { %vm1669_vm12 = vcmask 257024  }
  0x1a   :  { %1843 = vmatpush3.bf16.msra.mxu1 %v1938_v7  ;;  %v1706_v8 = vld [vmem:[%s2712_s30] ss:$0 sm:$0xff]  ;;  %v2180_v20 = vsub.s32 %v155_v18, %v157_v19 }
  0x1b   :  { %1878 = vmatprep.subr.bf16.mxu1 %v2045_v1  ;;  %v65_v42 = vld [vmem:[%s2713_s22] sm:$0xff]  ;;  %v66_v46 = vld [vmem:[%s2713_s22 + $0x8] sm:$0xff]  ;;  %v67_v47 = vld [vmem:[%s2713_s22 + $0x10] sm:$0xff] }
  0x1c   :  { %v68_v48 = vld [vmem:[%s2713_s22 + $0x18] sm:$0xff]  ;;  %v69_v56 = vld [vmem:[%s2713_s22 + $0x20] sm:$0xff]  ;;  %v70_v57 = vld [vmem:[%s2713_s22 + $0x28] sm:$0xff] }
  0x1d   :  { %v72_v15 = vld [vmem:[%s2713_s22 + $0x38] sm:$0xff] }
  0xd3   :  { %v143_v9 = vpop.f32.mrf.mxu1 }
  0xd4   :  { %v144_v10 = vadd.f32 %v1706_v8, %v143_v9 }
  0xd5   :  { %v1838_v11 = vpop.f32.mrf.mxu1 }
  0xd6   :  { %952 = vrot.lane.b32.xlu1 %v144_v10, %s2047_s20  ;;  %330 = vrot.lane.b32.xlu0 %v144_v10, %s2048_s21  ;;  %v159_v21 = vrot.slane %v144_v10, %v2180_v20  ;;  %v152_v22 = vcombine.high %v144_v10, %v144_v10 }
  0xd7   :  { %v146_v12 = vpop.f32.mrf.mxu1 }
  0xd8   :  { %v147_v13 = vadd.f32 %v1706_v8, %v146_v12  ;;  %v167_v23 = vcombine.high %v159_v21, %v159_v21  ;;  %v166_v24 = vrot.slane %v152_v22, %v2180_v20  ;;  %v175_v25 = vrot.slane %v159_v21, %v2180_v20  ;;  %v73_v21 = vld [vmem:[%s2713_s22 + $0x40] sm:$0xff]  ;;  %v74_v22 = vld [vmem:[%s2713_s22 + $0x48] sm:$0xff] }
  0xd9   :  { %v1839_v14 = vpop.f32.mrf.mxu1 }
  0xda   :  { %954 = vrot.lane.b32.xlu1 %v147_v13, %s2047_s20  ;;  %332 = vrot.lane.b32.xlu0 %v147_v13, %s2048_s21  ;;  %v189_v26 = vrot.slane %v167_v23, %v2180_v20  ;;  %v168_v27 = vcombine.high %v166_v24, %v166_v24  ;;  %v208_v28 = vrot.slane %v147_v13, %v2180_v20  ;;  %v71_v14 = vld [vmem:[%s2713_s22 + $0x30] sm:$0xff] }
  0xdb   :  { %v182_v29 = vrot.slane %v166_v24, %v2180_v20  ;;  %v201_v31 = vcombine.high %v147_v13, %v147_v13  ;;  %v197_v32 = vcombine.high %v175_v25, %v175_v25  ;;  %v253_v37 = vrot.slane %v175_v25, %v2188_v30 }
  0xdc   :  { %v199_v33 = vcombine.high %v189_v26, %v189_v26  ;;  %v196_v34 = vrot.slane %v168_v27, %v2180_v20  ;;  %v216_v35 = vcombine.high %v208_v28, %v208_v28  ;;  %v224_v41 = vrot.slane %v208_v28, %v2180_v20 }
  0xdd   :  { %v198_v36 = vcombine.high %v182_v29, %v182_v29  ;;  %v215_v38 = vrot.slane %v201_v31, %v2180_v20  ;;  %v261_v39 = vrot.slane %v197_v32, %v2188_v30  ;;  %v257_v43 = vrot.slane %v189_v26, %v2188_v30 }
  0xde   :  { %v265_v40 = vrot.slane %v199_v33, %v2188_v30  ;;  %v238_v44 = vrot.slane %v216_v35, %v2180_v20  ;;  %v269_v49 = vrot.slane %v182_v29, %v2188_v30  ;;  %v273_v50 = vrot.slane %v196_v34, %v2188_v30 }
  0xdf   :  { %v200_v51 = vcombine.high %v196_v34, %v196_v34  ;;  %v217_v58 = vcombine.high %v215_v38, %v215_v38  ;;  %v277_v4 = vrot.slane %v198_v36, %v2188_v30  ;;  %v285_v6 = vrot.slane %v224_v41, %v2188_v30 }
  0xe0   :  { %v289_v10 = vrot.slane %v238_v44, %v2188_v30  ;;  %v246_v18 = vcombine.high %v224_v41, %v224_v41  ;;  %v248_v19 = vcombine.high %v238_v44, %v238_v44  ;;  %v231_v23 = vrot.slane %v215_v38, %v2180_v20  ;;  %v76_v38 = vld [vmem:[%s2713_s22 + $0x58] sm:$0xff] }
  0xe1   :  { %v281_v5 = vrot.slane %v200_v51, %v2188_v30  ;;  %v245_v24 = vrot.slane %v217_v58, %v2180_v20 }
  0xe2   :  { %v293_v29 = vrot.slane %v246_v18, %v2188_v30  ;;  %v297_v31 = vrot.slane %v248_v19, %v2188_v30  ;;  %v301_v32 = vrot.slane %v231_v23, %v2188_v30  ;;  %v247_v41 = vcombine.high %v231_v23, %v231_v23 }
  0xe3   :  { %v305_v33 = vrot.slane %v245_v24, %v2188_v30  ;;  %v249_v44 = vcombine.high %v245_v24, %v245_v24 }
 0x148   :  { %v331_v45 = vpop.permute.xlu0 %330 }
 0x149   :  { %v336_v52 = vmul.f32 %v331_v45, %v253_v37  ;;  %v337_v53 = vmul.f32 %v331_v45, %v257_v43  ;;  %v338_v54 = vmul.f32 %v331_v45, %v261_v39  ;;  %v339_v55 = vmul.f32 %v331_v45, %v265_v40  ;;  %v75_v37 = vld [vmem:[%s2713_s22 + $0x50] sm:$0xff]  ;;  %v78_v43 = vld [vmem:[%s2713_s22 + $0x68] sm:$0xff] }
 0x14a   :  { %v340_v59 = vmul.f32 %v331_v45, %v269_v49  ;;  %v341_v60 = vmul.f32 %v331_v45, %v273_v50  ;;  %v342_v11 = vmul.f32 %v331_v45, %v277_v4  ;;  %v343_v12 = vmul.f32 %v331_v45, %v281_v5 }
 0x14b   :  { %v352_v61 = vmul.f32 %v336_v52, %v65_v42  ;;  %v353_v62 = vmul.f32 %v337_v53, %v66_v46  ;;  %v354_v63 = vmul.f32 %v338_v54, %v67_v47  ;;  %v355_v0 = vmul.f32 %v339_v55, %v68_v48  ;;  %v77_v42 = vld [vmem:[%s2713_s22 + $0x60] sm:$0xff]  ;;  %v79_v55 = vld [vmem:[%s2713_s22 + $0x70] sm:$0xff] }
 0x14c   :  { %v356_v2 = vmul.f32 %v340_v59, %v69_v56  ;;  %v357_v3 = vmul.f32 %v341_v60, %v70_v57  ;;  %v333_v7 = vpop.permute.xlu0 %332  ;;  %v358_v25 = vmul.f32 %v342_v11, %v71_v14  ;;  %v359_v26 = vmul.f32 %v343_v12, %v72_v15  ;;  %v80_v56 = vld [vmem:[%s2713_s22 + $0x78] sm:$0xff]  ;;  %v818_v59 = vld [vmem:[%s2688_s5] sm:$0x3] }
 0x14d   :  { %v2221_v8 = vpack.c.bf16 %v353_v62, %v352_v61  ;;  %v2223_v9 = vpack.c.bf16 %v355_v0, %v354_v63  ;;  %v344_v16 = vmul.f32 %v333_v7, %v285_v6  ;;  %v345_v17 = vmul.f32 %v333_v7, %v289_v10  ;;  %1926 = vmatprep.subr.msk.bf16.mxu0 %vm851_vm2, %v818_v59 }
 0x14e   :  { %v2228_v13 = vpack.c.bf16 %v357_v3, %v356_v2  ;;  %v2252_v34 = vpack.c.bf16 %v359_v26, %v358_v25  ;;  %v346_v35 = vmul.f32 %v333_v7, %v293_v29  ;;  %v347_v36 = vmul.f32 %v333_v7, %v297_v31 }
 0x14f   :  { %1844 = vmatprep.mubr.msk.bf16.mxu1 %vm105_vm1, %v2221_v8  ;;  %v360_v27 = vmul.f32 %v344_v16, %v73_v21  ;;  %v361_v28 = vmul.f32 %v345_v17, %v74_v22  ;;  %v348_v39 = vmul.f32 %v333_v7, %v301_v32  ;;  %v349_v40 = vmul.f32 %v333_v7, %v305_v33 }
 0x150   :  { %1845 = vmatmul.mubr.msk.bf16.vlgmr.msra.gmra.mxu1 %vm105_vm1, %v2223_v9  ;;  %v362_v45 = vmul.f32 %v346_v35, %v75_v37  ;;  %v363_v46 = vmul.f32 %v347_v36, %v76_v38  ;;  %v309_v49 = vrot.slane %v247_v41, %v2188_v30  ;;  %v313_v50 = vrot.slane %v249_v44, %v2188_v30 }
 0x151   :  { %1848 = vmatprep.mubr.msk.bf16.mxu1 %vm105_vm1, %v2228_v13  ;;  %v2254_v20 = vpack.c.bf16 %v361_v28, %v360_v27  ;;  %v364_v47 = vmul.f32 %v348_v39, %v77_v42  ;;  %v365_v48 = vmul.f32 %v349_v40, %v78_v43  ;;  %v853_v60 = vsel %vm851_vm2, %v818_v59, 0 }
 0x152   :  { %v2274_v51 = vpack.c.bf16 %v363_v46, %v362_v45  ;;  %v350_v52 = vmul.f32 %v333_v7, %v309_v49  ;;  %v351_v53 = vmul.f32 %v333_v7, %v313_v50  ;;  %1861 = vmatpush3.bf16.msra.mxu0 %v853_v60 }
 0x153   :  { %v2276_v54 = vpack.c.bf16 %v365_v48, %v364_v47  ;;  %1886 = vmatprep.subr.bf16.mxu0 %v2045_v1 }
 0x154   :  { %v366_v30 = vmul.f32 %v350_v52, %v79_v55  ;;  %v367_v57 = vmul.f32 %v351_v53, %v80_v56 }
 0x156   :  { %v2288_v58 = vpack.c.bf16 %v367_v57, %v366_v30 }
 0x158   :  { %1849 = vmatmul.mubr.msk.bf16.gmra.mxu1 %vm105_vm1, %v2252_v34 }
 0x159   :  { %1852 = vmatprep.mubr.msk.bf16.mxu1 %vm105_vm1, %v2254_v20 }
 0x160   :  { %1853 = vmatmul.mubr.msk.bf16.gmra.mxu1 %vm105_vm1, %v2274_v51 }
 0x161   :  { %1856 = vmatprep.mubr.msk.bf16.mxu1 %vm105_vm1, %v2276_v54 }
 0x168   :  { %1857 = vmatmul.mubr.msk.bf16.gmra.mxu1 %vm105_vm1, %v2288_v58 }
 0x169   :  { %1882 = vmatprep.mubr.msk.bf16.mxu1 %vm2046_vm0, %v2045_v1 }
 0x210   :  { %v1846_v61 = vpop.f32.mrf.mxu1 }
 0x211   :  { %v528_v62 = vsel %vm513_vm3, %v1846_v61, -inf }
 0x212   :  { %v529_v63 = vrot.slane %v528_v62, 4  ;;  %v450_v0 = vpop.f32.mrf.mxu1 }
 0x213   :  { %v514_v2 = vsel %vm513_vm3, %v450_v0, -inf }
 0x214   :  { %v530_v3 = vmax.f32 %v528_v62, %v529_v63  ;;  %v515_v4 = vrot.slane %v514_v2, 4  ;;  %v1847_v5 = vpop.f32.mrf.mxu1 }
 0x215   :  { %v535_v6 = vsel %vm513_vm3, %v1847_v5, -inf }
 0x216   :  { %v531_v7 = vrot.slane %v530_v3, 2  ;;  %v516_v10 = vmax.f32 %v514_v2, %v515_v4  ;;  %v536_v11 = vrot.slane %v535_v6, 4  ;;  %v453_v12 = vpop.f32.mrf.mxu1 }
 0x217   :  { %v521_v14 = vsel %vm513_vm3, %v453_v12, -inf }
 0x218   :  { %v532_v15 = vmax.f32 %v530_v3, %v531_v7  ;;  %v517_v16 = vrot.slane %v516_v10, 2  ;;  %v537_v17 = vmax.f32 %v535_v6, %v536_v11  ;;  %v522_v18 = vrot.slane %v521_v14, 4  ;;  %v2302_v19 = vpop.f32.mrf.mxu1 }
 0x219   :  { %v556_v21 = vsel %vm513_vm3, %v2302_v19, -inf }
 0x21a   :  { %v533_v22 = vrot.slane %v532_v15, 1  ;;  %v518_v23 = vmax.f32 %v516_v10, %v517_v16  ;;  %v538_v24 = vrot.slane %v537_v17, 2  ;;  %v523_v25 = vmax.f32 %v521_v14, %v522_v18  ;;  %v2306_v26 = vpop.f32.mrf.mxu1 }
 0x21b   :  { %v557_v27 = vrot.slane %v556_v21, 4  ;;  %v542_v28 = vsel %vm513_vm3, %v2306_v26, -inf }
 0x21c   :  { %v534_v29 = vmax.f32 %v532_v15, %v533_v22  ;;  %v519_v31 = vrot.slane %v518_v23, 1  ;;  %v539_v32 = vmax.f32 %v537_v17, %v538_v24  ;;  %v524_v33 = vrot.slane %v523_v25, 2  ;;  %v2310_v35 = vpop.f32.mrf.mxu1 }
 0x21d   :  { %v558_v36 = vmax.f32 %v556_v21, %v557_v27  ;;  %v543_v37 = vrot.slane %v542_v28, 4  ;;  %v563_v38 = vsel %vm513_vm3, %v2310_v35, -inf }
 0x21e   :  { %v628_v39 = vsub.f32 %v1846_v61, %v534_v29  ;;  %v520_v40 = vmax.f32 %v518_v23, %v519_v31  ;;  %v540_v41 = vrot.slane %v539_v32, 1  ;;  %v525_v42 = vmax.f32 %v523_v25, %v524_v33  ;;  %v2314_v43 = vpop.f32.mrf.mxu1 }
 0x21f   :  { %v559_v44 = vrot.slane %v558_v36, 2  ;;  %v544_v45 = vmax.f32 %v542_v28, %v543_v37  ;;  %v564_v46 = vrot.slane %v563_v38, 4  ;;  %v549_v47 = vsel %vm513_vm3, %v2314_v43, -inf }
 0x220   :  { %v646_v48 = vmul.f32 1.442695, %v628_v39  ;;  %v626_v49 = vsub.f32 %v450_v0, %v520_v40  ;;  %v541_v50 = vmax.f32 %v539_v32, %v540_v41  ;;  %v526_v52 = vrot.slane %v525_v42, 1  ;;  %v2318_v53 = vpop.f32.mrf.mxu1 }
 0x221   :  { %v560_v55 = vmax.f32 %v558_v36, %v559_v44  ;;  %v545_v56 = vrot.slane %v544_v45, 2  ;;  %v565_v30 = vmax.f32 %v563_v38, %v564_v46  ;;  %v550_v57 = vrot.slane %v549_v47, 4 }
 0x222   :  { %1949 = vpow2.f32 %v646_v48  ;;  %v642_v59 = vmul.f32 1.442695, %v626_v49  ;;  %v629_v60 = vsub.f32 %v1847_v5, %v541_v50  ;;  %v527_v61 = vmax.f32 %v525_v42, %v526_v52  ;;  %v2320_v62 = vpop.f32.mrf.mxu1 }
 0x223   :  { %v561_v63 = vrot.slane %v560_v55, 1  ;;  %v546_v2 = vmax.f32 %v544_v45, %v545_v56  ;;  %v566_v3 = vrot.slane %v565_v30, 2  ;;  %v551_v4 = vmax.f32 %v549_v47, %v550_v57 }
 0x224   :  { %1951 = vpow2.f32 %v642_v59  ;;  %v648_v0 = vmul.f32 1.442695, %v629_v60  ;;  %v627_v6 = vsub.f32 %v453_v12, %v527_v61  ;;  %v584_v7 = vsel %vm513_vm3, %v2318_v53, -inf  ;;  %v2324_v10 = vpop.f32.mrf.mxu1 }
 0x225   :  { %v562_v11 = vmax.f32 %v560_v55, %v561_v63  ;;  %v547_v14 = vrot.slane %v546_v2, 1  ;;  %v567_v15 = vmax.f32 %v565_v30, %v566_v3  ;;  %v552_v16 = vrot.slane %v551_v4, 2 }
 0x226   :  { %1953 = vpow2.f32 %v648_v0  ;;  %v644_v5 = vmul.f32 1.442695, %v627_v6  ;;  %v585_v17 = vrot.slane %v584_v7, 4  ;;  %v570_v18 = vsel %vm513_vm3, %v2320_v62, -inf  ;;  %v2328_v21 = vpop.f32.mrf.mxu1 }
 0x227   :  { %v632_v22 = vsub.f32 %v2302_v19, %v562_v11  ;;  %v548_v12 = vmax.f32 %v546_v2, %v547_v14  ;;  %v568_v23 = vrot.slane %v567_v15, 1  ;;  %v553_v24 = vmax.f32 %v551_v4, %v552_v16 }
 0x228   :  { %v586_v25 = vmax.f32 %v584_v7, %v585_v17  ;;  %v571_v27 = vrot.slane %v570_v18, 4  ;;  %v591_v28 = vsel %vm513_vm3, %v2324_v10, -inf  ;;  %1955 = vpow2.f32 %v644_v5  ;;  %v2336_v19 = vpop.f32.mrf.mxu1 }
 0x229   :  { %v630_v29 = vsub.f32 %v2306_v26, %v548_v12  ;;  %v569_v31 = vmax.f32 %v567_v15, %v568_v23  ;;  %v554_v32 = vrot.slane %v553_v24, 1  ;;  %v592_v37 = vrot.slane %v591_v28, 4 }
 0x22a   :  { %v587_v33 = vrot.slane %v586_v25, 2  ;;  %v572_v36 = vmax.f32 %v570_v18, %v571_v27  ;;  %v577_v38 = vsel %vm513_vm3, %v2328_v21, -inf  ;;  %v654_v39 = vmul.f32 1.442695, %v632_v22  ;;  %v2357_v27 = vpop.f32.mrf.mxu1 }
 0x22b   :  { %v650_v40 = vmul.f32 1.442695, %v630_v29  ;;  %v633_v41 = vsub.f32 %v2310_v35, %v569_v31  ;;  %v555_v42 = vmax.f32 %v553_v24, %v554_v32  ;;  %v593_v46 = vmax.f32 %v591_v28, %v592_v37 }
 0x22c   :  { %v588_v44 = vmax.f32 %v586_v25, %v587_v33  ;;  %v573_v45 = vrot.slane %v572_v36, 2  ;;  %v578_v47 = vrot.slane %v577_v38, 4  ;;  %v612_v49 = vsel %vm513_vm3, %v2336_v19, -inf }
 0x22d   :  { %1957 = vpow2.f32 %v650_v40  ;;  %v656_v26 = vmul.f32 1.442695, %v633_v41  ;;  %v631_v48 = vsub.f32 %v2314_v43, %v555_v42  ;;  %v594_v55 = vrot.slane %v593_v46, 2 }
 0x22e   :  { %v589_v50 = vrot.slane %v588_v44, 1  ;;  %v574_v52 = vmax.f32 %v572_v36, %v573_v45  ;;  %v579_v56 = vmax.f32 %v577_v38, %v578_v47  ;;  %1959 = vpow2.f32 %v654_v39 }
 0x22f   :  { %v2342_v30 = vpop.eup %1949  ;;  %v652_v35 = vmul.f32 1.442695, %v631_v48  ;;  %v613_v57 = vrot.slane %v612_v49, 4  ;;  %v595_v63 = vmax.f32 %v593_v46, %v594_v55  ;;  %v598_v36 = vsel %vm513_vm3, %v2357_v27, -inf }
 0x230   :  { %v688_v59 = vsel %vm513_vm3, %v2342_v30, 0.0  ;;  %v590_v60 = vmax.f32 %v588_v44, %v589_v50  ;;  %v575_v61 = vrot.slane %v574_v52, 1  ;;  %v580_v3 = vrot.slane %v579_v56, 2  ;;  %v2374_v50 = vpop.f32.mrf.mxu1 }
 0x231   :  { %v2346_v2 = vpop.eup %1951  ;;  %v689_v43 = vrot.slane %v688_v59, 4  ;;  %1961 = vpow2.f32 %v652_v35  ;;  %v614_v4 = vmax.f32 %v612_v49, %v613_v57  ;;  %v596_v6 = vrot.slane %v595_v63, 1 }
 0x232   :  { %1963 = vpow2.f32 %v656_v26  ;;  %v576_v0 = vmax.f32 %v574_v52, %v575_v61  ;;  %v636_v14 = vsub.f32 %v2318_v53, %v590_v60  ;;  %v581_v15 = vmax.f32 %v579_v56, %v580_v3 }
 0x233   :  { %v2348_v7 = vpop.eup %1953  ;;  %v690_v11 = vadd.f32 %v689_v43, %v688_v59  ;;  %v597_v17 = vmax.f32 %v595_v63, %v596_v6  ;;  %v615_v18 = vrot.slane %v614_v4, 2  ;;  %v674_v53 = vsel %vm513_vm3, %v2346_v2, 0.0 }
 0x234   :  { %v695_v16 = vsel %vm513_vm3, %v2348_v7, 0.0  ;;  %v634_v5 = vsub.f32 %v2320_v62, %v576_v0  ;;  %v582_v12 = vrot.slane %v581_v15, 1  ;;  %v662_v29 = vmul.f32 1.442695, %v636_v14 }
 0x235   :  { %v696_v22 = vrot.slane %v695_v16, 4  ;;  %v2354_v23 = vpop.eup %1955  ;;  %v637_v25 = vsub.f32 %v2324_v10, %v597_v17  ;;  %v691_v28 = vrot.slane %v690_v11, 2  ;;  %v616_v62 = vmax.f32 %v614_v4, %v615_v18 }
 0x236   :  { %v658_v24 = vmul.f32 1.442695, %v634_v5  ;;  %v583_v32 = vmax.f32 %v581_v15, %v582_v12  ;;  %v681_v10 = vsel %vm513_vm3, %v2354_v23, 0.0  ;;  %v675_v39 = vrot.slane %v674_v53, 4 }
 0x237   :  { %v664_v31 = vmul.f32 1.442695, %v637_v25  ;;  %v697_v33 = vadd.f32 %v696_v22, %v695_v16  ;;  %v617_v40 = vrot.slane %v616_v62, 1  ;;  %v692_v42 = vadd.f32 %v691_v28, %v690_v11 }
 0x238   :  { %1965 = vpow2.f32 %v658_v24  ;;  %v635_v38 = vsub.f32 %v2328_v21, %v583_v32  ;;  %v599_v46 = vrot.slane %v598_v36, 4  ;;  %v682_v26 = vrot.slane %v681_v10, 4 }
 0x239   :  { %1967 = vpow2.f32 %v664_v31  ;;  %v698_v47 = vrot.slane %v697_v33, 2  ;;  %v676_v52 = vadd.f32 %v675_v39, %v674_v53  ;;  %v618_v56 = vmax.f32 %v616_v62, %v617_v40  ;;  %v2395_v40 = vpop.f32.mrf.mxu1 }
 0x23a   :  { %v2363_v37 = vpop.eup %1957  ;;  %1969 = vpow2.f32 %v662_v29  ;;  %v660_v45 = vmul.f32 1.442695, %v635_v38  ;;  %v693_v35 = vrot.slane %v692_v42, 1  ;;  %v600_v60 = vmax.f32 %v598_v36, %v599_v46 }
 0x23b   :  { %v2368_v41 = vpop.eup %1959  ;;  %v702_v44 = vsel %vm513_vm3, %v2363_v37, 0.0  ;;  %v699_v61 = vadd.f32 %v698_v47, %v697_v33  ;;  %v683_v63 = vadd.f32 %v682_v26, %v681_v10  ;;  %v619_v3 = vsel %vm513_vm3, %v2374_v50, -inf }
 0x23c   :  { %v703_v49 = vrot.slane %v702_v44, 4  ;;  %1971 = vpow2.f32 %v660_v45  ;;  %v716_v57 = vsel %vm513_vm3, %v2368_v41, 0.0  ;;  %v601_v6 = vrot.slane %v600_v60, 2 }
 0x23d   :  { %v717_v11 = vrot.slane %v716_v57, 4  ;;  %v640_v14 = vsub.f32 %v2336_v19, %v618_v56  ;;  %v620_v15 = vrot.slane %v619_v3, 4  ;;  %v694_v16 = vadd.f32 %v693_v35, %v692_v42 }
 0x23e   :  { %v2372_v48 = vpop.eup %1961  ;;  %v704_v43 = vadd.f32 %v703_v49, %v702_v44  ;;  %v677_v5 = vrot.slane %v676_v52, 2  ;;  %v602_v18 = vmax.f32 %v600_v60, %v601_v6  ;;  %v700_v12 = vrot.slane %v699_v61, 1 }
 0x23f   :  { %v2376_v21 = vpop.eup %1963  ;;  %v709_v55 = vsel %vm513_vm3, %v2372_v48, 0.0  ;;  %v684_v24 = vrot.slane %v683_v63, 2  ;;  %v621_v31 = vmax.f32 %v619_v3, %v620_v15  ;;  %v718_v62 = vadd.f32 %v717_v11, %v716_v57 }
 0x240   :  { %v710_v59 = vrot.slane %v709_v55, 4  ;;  %v723_v4 = vsel %vm513_vm3, %v2376_v21, 0.0  ;;  %v705_v25 = vrot.slane %v704_v43, 2  ;;  %v603_v29 = vrot.slane %v602_v18, 1 }
 0x241   :  { %v724_v28 = vrot.slane %v723_v4, 4  ;;  %v670_v33 = vmul.f32 1.442695, %v640_v14  ;;  %1973 = vrcp.f32 %v694_v16  ;;  %v678_v10 = vadd.f32 %v677_v5, %v676_v52 }
 0x242   :  { %v711_v0 = vadd.f32 %v710_v59, %v709_v55  ;;  %v604_v39 = vmax.f32 %v602_v18, %v603_v29  ;;  %v701_v42 = vadd.f32 %v700_v12, %v699_v61  ;;  %v685_v44 = vadd.f32 %v684_v24, %v683_v63 }
 0x243   :  { %v706_v45 = vadd.f32 %v705_v25, %v704_v43  ;;  %v725_v46 = vadd.f32 %v724_v28, %v723_v4  ;;  %v622_v55 = vrot.slane %v621_v31, 2  ;;  %v719_v35 = vrot.slane %v718_v62, 2 }
 0x244   :  { %v712_v17 = vrot.slane %v711_v0, 2  ;;  %v638_v49 = vsub.f32 %v2357_v27, %v604_v39  ;;  %1975 = vpow2.f32 %v670_v33  ;;  %v605_v57 = vsel %vm513_vm3, %v2395_v40, -inf }
 0x245   :  { %v2387_v22 = vpop.eup %1965  ;;  %v623_v63 = vmax.f32 %v621_v31, %v622_v55  ;;  %v707_v43 = vrot.slane %v706_v45, 1  ;;  %v726_v3 = vrot.slane %v725_v46, 2  ;;  %v606_v11 = vrot.slane %v605_v57, 4 }
 0x246   :  { %v730_v53 = vsel %vm513_vm3, %v2387_v22, 0.0  ;;  %v2391_v32 = vpop.eup %1967  ;;  %v713_v38 = vadd.f32 %v712_v17, %v711_v0  ;;  %v666_v61 = vmul.f32 1.442695, %v638_v49  ;;  %v720_v14 = vadd.f32 %v719_v35, %v718_v62 }
 0x247   :  { %v731_v19 = vrot.slane %v730_v53, 4  ;;  %v2393_v36 = vpop.eup %1969  ;;  %v751_v26 = vsel %vm513_vm3, %v2391_v32, 0.0  ;;  %v624_v6 = vrot.slane %v623_v63, 1  ;;  %v679_v5 = vrot.slane %v678_v10, 1 }
 0x248   :  { %v744_v52 = vsel %vm513_vm3, %v2393_v36, 0.0  ;;  %v714_v59 = vrot.slane %v713_v38, 1  ;;  %v752_v27 = vrot.slane %v751_v26, 4  ;;  %1977 = vpow2.f32 %v666_v61 }
 0x249   :  { %v732_v47 = vadd.f32 %v731_v19, %v730_v53  ;;  %v2400_v56 = vpop.eup %1971  ;;  %v745_v15 = vrot.slane %v744_v52, 4  ;;  %1979 = vrcp.f32 %v701_v42  ;;  %v625_v18 = vmax.f32 %v623_v63, %v624_v6 }
 0x24a   :  { %v737_v60 = vsel %vm513_vm3, %v2400_v56, 0.0  ;;  %v715_v17 = vadd.f32 %v714_v59, %v713_v38  ;;  %v607_v12 = vmax.f32 %v605_v57, %v606_v11  ;;  %v708_v24 = vadd.f32 %v707_v43, %v706_v45 }
 0x24b   :  { %v738_v4 = vrot.slane %v737_v60, 4  ;;  %v733_v0 = vrot.slane %v732_v47, 2  ;;  %v727_v25 = vadd.f32 %v726_v3, %v725_v46  ;;  %v753_v28 = vadd.f32 %v752_v27, %v751_v26 }
 0x24c   :  { %v641_v31 = vsub.f32 %v2374_v50, %v625_v18  ;;  %v608_v19 = vrot.slane %v607_v12, 2  ;;  %v686_v33 = vrot.slane %v685_v44, 1  ;;  %v721_v39 = vrot.slane %v720_v14, 1 }
 0x24d   :  { %v739_v16 = vadd.f32 %v738_v4, %v737_v60  ;;  %v734_v29 = vadd.f32 %v733_v0, %v732_v47  ;;  %v746_v49 = vadd.f32 %v745_v15, %v744_v52  ;;  %v680_v62 = vadd.f32 %v679_v5, %v678_v10 }
 0x24e   :  { %1981 = vrcp.f32 %v715_v17  ;;  %v672_v35 = vmul.f32 1.442695, %v641_v31  ;;  %v609_v60 = vmax.f32 %v607_v12, %v608_v19  ;;  %v687_v42 = vadd.f32 %v686_v33, %v685_v44  ;;  %v1974_v38 = vpop.eup %1973 }
 0x24f   :  { %v740_v53 = vrot.slane %v739_v16, 2  ;;  %1983 = vrcp.f32 %v708_v24  ;;  %v728_v57 = vrot.slane %v727_v25, 1  ;;  %v754_v45 = vrot.slane %v753_v28, 2 }
 0x250   :  { %v735_v26 = vrot.slane %v734_v29, 1  ;;  %1985 = vpow2.f32 %v672_v35  ;;  %v610_v47 = vrot.slane %v609_v60, 1  ;;  %v722_v59 = vadd.f32 %v721_v39, %v720_v14 }
 0x251   :  { %v741_v55 = vadd.f32 %v740_v53, %v739_v16  ;;  %v747_v50 = vrot.slane %v746_v49, 2  ;;  %1987 = vrcp.f32 %v680_v62  ;;  %v2409_v61 = vpop.eup %1975  ;;  %v729_v10 = vadd.f32 %v728_v57, %v727_v25 }
 0x252   :  { %v611_v63 = vmax.f32 %v609_v60, %v610_v47  ;;  %1989 = vrcp.f32 %v687_v42  ;;  %v755_v43 = vadd.f32 %v754_v45, %v753_v28  ;;  %v736_v3 = vadd.f32 %v735_v26, %v734_v29 }
 0x253   :  { %v742_v46 = vrot.slane %v741_v55, 1  ;;  %1991 = vrcp.f32 %v722_v59  ;;  %v748_v4 = vadd.f32 %v747_v50, %v746_v49  ;;  %v772_v15 = vsel %vm513_vm3, %v2409_v61, 0.0 }
 0x254   :  { %v639_v44 = vsub.f32 %v2395_v40, %v611_v63  ;;  %v756_v11 = vrot.slane %v755_v43, 1  ;;  %v773_v18 = vrot.slane %v772_v15, 4  ;;  %v804_v42 = vmul.f32 %v1974_v38, %v2342_v30 }
 0x255   :  { %v743_v52 = vadd.f32 %v742_v46, %v741_v55  ;;  %v2412_v27 = vpop.eup %1977  ;;  %v749_v16 = vrot.slane %v748_v4, 1 }
 0x256   :  { %v668_v0 = vmul.f32 1.442695, %v639_v44  ;;  %v1980_v6 = vpop.eup %1979  ;;  %v758_v14 = vsel %vm513_vm3, %v2412_v27, 0.0  ;;  %v757_v17 = vadd.f32 %v756_v11, %v755_v43  ;;  %v774_v33 = vadd.f32 %v773_v18, %v772_v15 }
 0x257   :  { %1993 = vrcp.f32 %v743_v52  ;;  %v759_v5 = vrot.slane %v758_v14, 4  ;;  %v750_v25 = vadd.f32 %v749_v16, %v748_v4  ;;  %v805_v49 = vmul.f32 %v1980_v6, %v2348_v7 }
 0x258   :  { %1995 = vrcp.f32 %v729_v10  ;;  %v775_v47 = vrot.slane %v774_v33, 2 }
 0x259   :  { %1997 = vrcp.f32 %v736_v3  ;;  %v760_v53 = vadd.f32 %v759_v5, %v758_v14  ;;  %v820_v50 = vpack.c.bf16 %v805_v49, %v804_v42 }
 0x25a   :  { %1999 = vpow2.f32 %v668_v0  ;;  %v776_v38 = vadd.f32 %v775_v47, %v774_v33 }
 0x25b   :  { %v1982_v40 = vpop.eup %1981  ;;  %2001 = vrcp.f32 %v757_v17  ;;  %v761_v45 = vrot.slane %v760_v53, 2 }
 0x25c   :  { %v1984_v12 = vpop.eup %1983  ;;  %v807_v31 = vmul.f32 %v1982_v40, %v2372_v48  ;;  %2003 = vrcp.f32 %v750_v25  ;;  %v777_v14 = vrot.slane %v776_v38, 1 }
 0x25d   :  { %v2418_v24 = vpop.eup %1985  ;;  %v806_v35 = vmul.f32 %v1984_v12, %v2363_v37  ;;  %v762_v37 = vadd.f32 %v761_v45, %v760_v53 }
 0x25e   :  { %v1988_v28 = vpop.eup %1987  ;;  %v779_v29 = vsel %vm513_vm3, %v2418_v24, 0.0 }
 0x25f   :  { %v1990_v19 = vpop.eup %1989  ;;  %v780_v39 = vrot.slane %v779_v29, 4  ;;  %v802_v55 = vmul.f32 %v1988_v28, %v2346_v2  ;;  %v821_v48 = vpack.c.bf16 %v807_v31, %v806_v35  ;;  %v763_v0 = vrot.slane %v762_v37, 1 }
 0x260   :  { %v803_v62 = vmul.f32 %v1990_v19, %v2354_v23  ;;  %v1992_v57 = vpop.eup %1991 }
 0x261   :  { %v781_v60 = vadd.f32 %v780_v39, %v779_v29  ;;  %v808_v4 = vmul.f32 %v1992_v57, %v2368_v41  ;;  %v764_v17 = vadd.f32 %v763_v0, %v762_v37 }
 0x262   :  { %v819_v46 = vpack.c.bf16 %v803_v62, %v802_v55  ;;  %v1939_v62 = vld [vmem:[%s2689_s6 + $0x8] sm:$0xff]  }
 0x263   :  { %v782_v59 = vrot.slane %v781_v60, 2  ;;  %1879 = vmatpush3.bf16.msra.mxu1 %v1939_v62 }
 0x264   :  { %v1994_v26 = vpop.eup %1993  ;;  %1862 = vmatprep.mubr.msk.bf16.mxu0 %vm513_vm3, %v819_v46  ;;  %1880 = vmatprep.subr.bf16.mxu1 %v2045_v1 }
 0x265   :  { %v1996_v52 = vpop.eup %1995  ;;  %v783_v7 = vadd.f32 %v782_v59, %v781_v60  ;;  %1863 = vmatmul.mubr.msk.bf16.vlgmr.msra.gmra.mxu0 %vm513_vm3, %v820_v50  ;;  %v811_v30 = vmul.f32 %v1994_v26, %v2400_v56 }
 0x266   :  { %v1998_v2 = vpop.eup %1997  ;;  %1866 = vmatprep.mubr.msk.bf16.mxu0 %vm513_vm3, %v821_v48  ;;  %v809_v10 = vmul.f32 %v1996_v52, %v2376_v21  ;;  %v778_v21 = vadd.f32 %v777_v14, %v776_v38 }
 0x267   :  { %v2000_v23 = vpop.eup %1999  ;;  %v810_v3 = vmul.f32 %v1998_v2, %v2387_v22  ;;  %v784_v44 = vrot.slane %v783_v7, 1 }
 0x268   :  { %v765_v63 = vsel %vm513_vm3, %v2000_v23, 0.0  ;;  %v822_v15 = vpack.c.bf16 %v809_v10, %v808_v4  ;;  %v2002_v16 = vpop.eup %2001 }
 0x269   :  { %v766_v43 = vrot.slane %v765_v63, 4  ;;  %v823_v11 = vpack.c.bf16 %v811_v30, %v810_v3  ;;  %v785_v40 = vadd.f32 %v784_v44, %v783_v7  ;;  %v2004_v56 = vpop.eup %2003  ;;  %v813_v22 = vmul.f32 %v2002_v16, %v2391_v32 }
 0x26a   :  { %v812_v41 = vmul.f32 %v2004_v56, %v2393_v36 }
 0x26b   :  { %v767_v6 = vadd.f32 %v766_v43, %v765_v63  ;;  %2005 = vrcp.f32 %v785_v40 }
 0x26c   :  { %2007 = vrcp.f32 %v764_v17  ;;  %v824_v28 = vpack.c.bf16 %v813_v22, %v812_v41 }
 0x26d   :  { %v768_v5 = vrot.slane %v767_v6, 2  ;;  %1867 = vmatmul.mubr.msk.bf16.gmra.mxu0 %vm513_vm3, %v822_v15  ;;  %2009 = vrcp.f32 %v778_v21 }
 0x26e   :  { %1870 = vmatprep.mubr.msk.bf16.mxu0 %vm513_vm3, %v823_v11 }
 0x26f   :  { %v769_v18 = vadd.f32 %v768_v5, %v767_v6 }
 0x271   :  { %v770_v12 = vrot.slane %v769_v18, 1 }
 0x273   :  { %v771_v25 = vadd.f32 %v770_v12, %v769_v18 }
 0x275   :  { %2011 = vrcp.f32 %v771_v25  ;;  %1871 = vmatmul.mubr.msk.bf16.gmra.mxu0 %vm513_vm3, %v824_v28 }
 0x278   :  { %v2006_v53 = vpop.eup %2005 }
 0x279   :  { %v2008_v29 = vpop.eup %2007  ;;  %v817_v33 = vmul.f32 %v2006_v53, %v2418_v24 }
 0x27a   :  { %v2010_v31 = vpop.eup %2009  ;;  %v814_v39 = vmul.f32 %v2008_v29, %v2412_v27  ;;  %v953_v27 = vpop.permute.xlu1 %952 }
 0x27b   :  { %v816_v49 = vmul.f32 %v2010_v31, %v2409_v61  ;;  %v1940_v61 = vld [vmem:[%s2689_s6] sm:$0xff]  }
 0x27c   :  { %1881 = vmatpush3.bf16.msra.mxu1 %v1940_v61 }
 0x27d   :  { %v826_v36 = vpack.c.bf16 %v817_v33, %v816_v49  ;;  %1894 = vmatprep.subr.bf16.mxu1 %v2045_v1 }
 0x27e   :  { %v2462_v21 = vpop.permute.xlu1 %954 }
 0x282   :  { %v2012_v19 = vpop.eup %2011 }
 0x283   :  { %v815_v32 = vmul.f32 %v2012_v19, %v2000_v23 }
 0x285   :  { %v825_v55 = vpack.c.bf16 %v815_v32, %v814_v39 }
 0x287   :  { %1874 = vmatprep.mubr.msk.bf16.mxu0 %vm513_vm3, %v825_v55 }
 0x288   :  { %1875 = vmatmul.mubr.msk.bf16.gmra.mxu0 %vm513_vm3, %v826_v36 }
 0x289   :  { %1890 = vmatprep.mubr.msk.bf16.mxu0 %vm2046_vm0, %v2045_v1 }
 0x325   :  { %v1864_v24 = vpop.f32.mrf.mxu0 }
 0x326   :  { %v960_v35 = vmul.f32 %v1864_v24, %v953_v27 }
 0x327   :  { %v889_v60 = vpop.f32.mrf.mxu0 }
 0x328   :  { %v988_v42 = vsel %vm105_vm1, %v960_v35, 0.0  ;;  %v958_v57 = vmul.f32 %v953_v27, %v889_v60 }
 0x329   :  { %v1865_v45 = vpop.f32.mrf.mxu0  ;;  %v989_v46 = vrot.slane %v988_v42, 4 }
 0x32a   :  { %v974_v48 = vsel %vm105_vm1, %v958_v57, 0.0  ;;  %v961_v26 = vmul.f32 %v1865_v45, %v953_v27 }
 0x32b   :  { %v892_v47 = vpop.f32.mrf.mxu0  ;;  %v975_v59 = vrot.slane %v974_v48, 4  ;;  %v990_v7 = vadd.f32 %v989_v46, %v988_v42 }
 0x32c   :  { %v959_v50 = vmul.f32 %v953_v27, %v892_v47  ;;  %v995_v52 = vsel %vm105_vm1, %v961_v26, 0.0 }
 0x32d   :  { %v1868_v2 = vpop.f32.mrf.mxu0  ;;  %v976_v38 = vadd.f32 %v975_v59, %v974_v48  ;;  %v996_v63 = vrot.slane %v995_v52, 4  ;;  %v991_v44 = vrot.slane %v990_v7, 2 }
 0x32e   :  { %v981_v23 = vsel %vm105_vm1, %v959_v50, 0.0  ;;  %v964_v4 = vmul.f32 %v1868_v2, %v953_v27 }
 0x32f   :  { %v982_v37 = vrot.slane %v981_v23, 4  ;;  %v905_v30 = vpop.f32.mrf.mxu0  ;;  %v977_v6 = vrot.slane %v976_v38, 2  ;;  %v997_v11 = vadd.f32 %v996_v63, %v995_v52  ;;  %v992_v40 = vadd.f32 %v991_v44, %v990_v7 }
 0x330   :  { %v962_v43 = vmul.f32 %v953_v27, %v905_v30  ;;  %v1016_v56 = vsel %vm105_vm1, %v964_v4, 0.0 }
 0x331   :  { %v983_v10 = vadd.f32 %v982_v37, %v981_v23  ;;  %v1869_v3 = vpop.f32.mrf.mxu0  ;;  %v978_v22 = vadd.f32 %v977_v6, %v976_v38  ;;  %v998_v12 = vrot.slane %v997_v11, 2  ;;  %v993_v29 = vrot.slane %v992_v40, 1 }
 0x332   :  { %v1002_v16 = vsel %vm105_vm1, %v962_v43, 0.0  ;;  %v965_v17 = vmul.f32 %v1869_v3, %v953_v27  ;;  %v1017_v31 = vrot.slane %v1016_v56, 4 }
 0x333   :  { %v908_v0 = vpop.f32.mrf.mxu0  ;;  %v984_v15 = vrot.slane %v983_v10, 2  ;;  %v1003_v41 = vrot.slane %v1002_v16, 4  ;;  %v979_v55 = vrot.slane %v978_v22, 1  ;;  %v999_v36 = vadd.f32 %v998_v12, %v997_v11 }
 0x334   :  { %v963_v14 = vmul.f32 %v953_v27, %v908_v0  ;;  %v1023_v33 = vsel %vm105_vm1, %v965_v17, 0.0  ;;  %v994_v60 = vadd.f32 %v993_v29, %v992_v40  ;;  %v1018_v42 = vadd.f32 %v1017_v31, %v1016_v56 }
 0x335   :  { %v1872_v5 = vpop.f32.mrf.mxu0  ;;  %v985_v28 = vadd.f32 %v984_v15, %v983_v10  ;;  %v1004_v62 = vadd.f32 %v1003_v41, %v1002_v16  ;;  %v1024_v57 = vrot.slane %v1023_v33, 4  ;;  %v980_v59 = vadd.f32 %v979_v55, %v978_v22 }
 0x336   :  { %v1009_v25 = vsel %vm105_vm1, %v963_v14, 0.0  ;;  %v968_v53 = vmul.f32 %v1872_v5, %v2462_v21  ;;  %v1000_v50 = vrot.slane %v999_v36, 1  ;;  %v1092_v23 = vpack.c.bf16 %v994_v60, %v994_v60 }
 0x337   :  { %v921_v18 = vpop.f32.mrf.mxu0  ;;  %v1010_v39 = vrot.slane %v1009_v25, 4  ;;  %v986_v61 = vrot.slane %v985_v28, 1  ;;  %v1005_v2 = vrot.slane %v1004_v62, 2  ;;  %v1019_v37 = vrot.slane %v1018_v42, 2 }
 0x338   :  { %v1044_v32 = vsel %vm105_vm1, %v968_v53, 0.0  ;;  %v966_v49 = vmul.f32 %v2462_v21, %v921_v18  ;;  %v1025_v63 = vadd.f32 %v1024_v57, %v1023_v33  ;;  %v1090_v44 = vpack.c.bf16 %v980_v59, %v980_v59 }
 0x339   :  { %v1873_v19 = vpop.f32.mrf.mxu0  ;;  %v1045_v27 = vrot.slane %v1044_v32, 4  ;;  %v1011_v45 = vadd.f32 %v1010_v39, %v1009_v25  ;;  %v987_v52 = vadd.f32 %v986_v61, %v985_v28  ;;  %v2473_v4 = vadd.f32 %v1000_v50, %v999_v36 }
 0x33a   :  { %v1030_v24 = vsel %vm105_vm1, %v966_v49, 0.0  ;;  %v969_v35 = vmul.f32 %v1873_v19, %v2462_v21  ;;  %v1006_v14 = vadd.f32 %v1005_v2, %v1004_v62  ;;  %v2476_v5 = vadd.f32 %v1019_v37, %v1018_v42 }
 0x33b   :  { %v1046_v46 = vadd.f32 %v1045_v27, %v1044_v32  ;;  %v1031_v48 = vrot.slane %v1030_v24, 4  ;;  %v924_v47 = vpop.f32.mrf.mxu0  ;;  %v1012_v10 = vrot.slane %v1011_v45, 2  ;;  %v1091_v11 = vpack.c.bf16 %v987_v52, %v987_v52 }
 0x33c   :  { %v1051_v26 = vsel %vm105_vm1, %v969_v35, 0.0  ;;  %v967_v38 = vmul.f32 %v2462_v21, %v924_v47  ;;  %v1026_v56 = vrot.slane %v1025_v63, 2  ;;  %v1124_v41 = vunpack.c.l.b16 %v1092_v23 }
 0x33d   :  { %v1032_v7 = vadd.f32 %v1031_v48, %v1030_v24  ;;  %v1052_v30 = vrot.slane %v1051_v26, 4  ;;  %v1047_v43 = vrot.slane %v1046_v46, 2  ;;  %v1013_v17 = vadd.f32 %v1012_v10, %v1011_v45 }
 0x33e   :  { %v1037_v6 = vsel %vm105_vm1, %v967_v38, 0.0  ;;  %v1122_v25 = vunpack.c.l.b16 %v1090_v44  ;;  %v1093_v29 = vpack.c.bf16 %v2473_v4, %v2473_v4  ;;  %v1123_v31 = vunpack.c.l.b16 %v1091_v11 }
 0x33f   :  { %v1033_v3 = vrot.slane %v1032_v7, 2  ;;  %v1053_v0 = vadd.f32 %v1052_v30, %v1051_v26  ;;  %v1038_v16 = vrot.slane %v1037_v6, 4  ;;  %v1048_v18 = vadd.f32 %v1047_v43, %v1046_v46 }
 0x340   :  { %v1007_v19 = vrot.slane %v1006_v14, 1  ;;  %v1021_v32 = vrot.slane %v2476_v5, 1  ;;  %v1027_v62 = vadd.f32 %v1026_v56, %v1025_v63  ;;  %v1014_v61 = vrot.slane %v1013_v17, 1 }
 0x341   :  { %v1034_v15 = vadd.f32 %v1033_v3, %v1032_v7  ;;  %v1054_v40 = vrot.slane %v1053_v0, 2  ;;  %v1039_v22 = vadd.f32 %v1038_v16, %v1037_v6  ;;  %v1049_v27 = vrot.slane %v1048_v18, 1 }
 0x342   :  { %v1139_v46 = vsel %vm1138_vm4, %v1123_v31, %v1122_v25  ;;  %v1008_v48 = vadd.f32 %v1007_v19, %v1006_v14  ;;  %v1015_v23 = vadd.f32 %v1014_v61, %v1013_v17  ;;  %v1028_v14 = vrot.slane %v1027_v62, 1 }
 0x343   :  { %v1035_v28 = vrot.slane %v1034_v15, 1  ;;  %v1040_v33 = vrot.slane %v1039_v22, 2  ;;  %v1055_v49 = vadd.f32 %v1054_v40, %v1053_v0  ;;  %v1050_v63 = vadd.f32 %v1049_v27, %v1048_v18 }
 0x344   :  { %v1141_v11 = vsel %vm1140_vm5, %v1124_v41, %v1139_v46  ;;  %v1095_v18 = vpack.c.bf16 %v1015_v23, %v1015_v23 }
 0x345   :  { %v1041_v24 = vadd.f32 %v1040_v33, %v1039_v22  ;;  %v1036_v60 = vadd.f32 %v1035_v28, %v1034_v15  ;;  %v1056_v50 = vrot.slane %v1055_v49, 1  ;;  %v1094_v22 = vpack.c.bf16 %v1008_v48, %v1008_v48 }
 0x346   :  { %v1125_v33 = vunpack.c.l.b16 %v1093_v29 }
 0x347   :  { %v1042_v26 = vrot.slane %v1041_v24, 1  ;;  %v1098_v10 = vpack.c.bf16 %v1036_v60, %v1036_v60  ;;  %v1057_v15 = vadd.f32 %v1056_v50, %v1055_v49 }
 0x348   :  { %v1876_v12 = vpop.f32.mrf.mxu0 }
 0x349   :  { %v972_v53 = vmul.f32 %v1876_v12, %v2462_v21  ;;  %v1043_v37 = vadd.f32 %v1042_v26, %v1041_v24  ;;  %v1100_v12 = vpack.c.bf16 %v1050_v63, %v1050_v63  ;;  %v1130_v28 = vunpack.c.l.b16 %v1098_v10 }
 0x34a   :  { %v937_v39 = vpop.f32.mrf.mxu0  ;;  %v1101_v41 = vpack.c.bf16 %v1057_v15, %v1057_v15  ;;  %v1126_v24 = vunpack.c.l.b16 %v1094_v22  ;;  %v1731_v15 = vld [vmem:[%s2690_s7] ss:$0 sm:$0xff]  ;;  %v2022_v22 = vld [vmem:[%s2711_s23 + $0x8] sm:$0xff] }
 0x34b   :  { %v1072_v55 = vsel %vm105_vm1, %v972_v53, 0.0  ;;  %v970_v36 = vmul.f32 %v2462_v21, %v937_v39  ;;  %v1099_v44 = vpack.c.bf16 %v1043_v37, %v1043_v37  ;;  %v1022_v39 = vadd.f32 %v1021_v32, %v2476_v5 }
 0x34c   :  { %v1877_v35 = vpop.f32.mrf.mxu0  ;;  %v1073_v42 = vrot.slane %v1072_v55, 4  ;;  %v1132_v60 = vunpack.c.l.b16 %v1100_v12  ;;  %v1133_v29 = vunpack.c.l.b16 %v1101_v41  ;;  %v1942_v41 = vld [vmem:[%s2693_s10] sm:$0xff]  }
 0x34d   :  { %v1058_v57 = vsel %vm105_vm1, %v970_v36, 0.0  ;;  %v973_v45 = vmul.f32 %v1877_v35, %v2462_v21  ;;  %v1143_v35 = vsel %vm1142_vm6, %v1125_v33, %v1141_v11  ;;  %v1096_v26 = vpack.c.bf16 %v1022_v39, %v1022_v39 }
 0x34e   :  { %v1059_v47 = vrot.slane %v1058_v57, 4  ;;  %v940_v59 = vpop.f32.mrf.mxu0  ;;  %v1074_v52 = vadd.f32 %v1073_v42, %v1072_v55  ;;  %v1029_v55 = vadd.f32 %v1028_v14, %v1027_v62  ;;  %v1145_v62 = vsel %vm1144_vm7, %v1126_v24, %v1143_v35 }
 0x34f   :  { %v1079_v2 = vsel %vm105_vm1, %v973_v45, 0.0  ;;  %v971_v7 = vmul.f32 %v2462_v21, %v940_v59  ;;  %v1131_v21 = vunpack.c.l.b16 %v1099_v44  ;;  %v1128_v37 = vunpack.c.l.b16 %v1096_v26 }
 0x350   :  { %v1060_v30 = vadd.f32 %v1059_v47, %v1058_v57  ;;  %v1080_v38 = vrot.slane %v1079_v2, 4  ;;  %v1075_v43 = vrot.slane %v1074_v52, 2  ;;  %v1127_v57 = vunpack.c.l.b16 %v1095_v18 }
 0x351   :  { %v1065_v3 = vsel %vm105_vm1, %v971_v7, 0.0  ;;  %v1152_v49 = vsel %vm1138_vm4, %v1131_v21, %v1130_v28  ;;  %v1097_v47 = vpack.c.bf16 %v1029_v55, %v1029_v55  ;;  %v1941_v55 = vld [vmem:[%s2693_s10 + $0x8] sm:$0xff]   ;;  %s2050_s10 = smov [#allocation2]  }
 0x352   :  { %v1061_v4 = vrot.slane %v1060_v30, 2  ;;  %v1081_v0 = vadd.f32 %v1080_v38, %v1079_v2  ;;  %v1066_v6 = vrot.slane %v1065_v3, 4  ;;  %v1076_v16 = vadd.f32 %v1075_v43, %v1074_v52  ;;  %1887 = vmatpush3.bf16.msra.mxu0 %v1941_v55  ;;  %s1691_s3 = sshll.u32 %s2050_s10, 4  ;;  %s1692_s3 = int_to_ptr.vmem [resolvable:$true] %s1691_s3 }
 0x353   :  { %v1153_v5 = vsel %vm1140_vm5, %v1132_v60, %v1152_v49  ;;  %v1147_v52 = vsel %vm1146_vm8, %v1127_v57, %v1145_v62  ;;  %v1129_v43 = vunpack.c.l.b16 %v1097_v47  ;;  %1888 = vmatprep.subr.bf16.mxu0 %v2045_v1  ;;  %v1943_v49 = vld [vmem:[%s2691_s8 + $0x8] sm:$0xff]   ;;  %p2028_p1 = scmp.lt.s32.totalorder %s1692_s3, %s1692_s3 }
 0x354   :  { %v1062_v40 = vadd.f32 %v1061_v4, %v1060_v30  ;;  %v1082_v56 = vrot.slane %v1081_v0, 2  ;;  %v1067_v17 = vadd.f32 %v1066_v6, %v1065_v3  ;;  %v1077_v25 = vrot.slane %v1076_v16, 1 }
 0x355   :  { %v1154_v2 = vsel %vm1142_vm6, %v1133_v29, %v1153_v5  ;;  %v1149_v38 = vsel %vm1148_vm9, %v1128_v37, %v1147_v52  ;;  %v1733_v37 = vld [vmem:[%s2698_s15] ss:$0 sm:$0xff] }
 0x356   :  { %v1063_v53 = vrot.slane %v1062_v40, 1  ;;  %v1083_v31 = vadd.f32 %v1082_v56, %v1081_v0  ;;  %v1068_v19 = vrot.slane %v1067_v17, 2  ;;  %v1078_v42 = vadd.f32 %v1077_v25, %v1076_v16  ;;  %v2021_v16 = vld [vmem:[%s2711_s23] sm:$0xff]  ;;  %1889 = vmatpush3.bf16.msra.mxu0 %v1942_v41 }
 0x357   :  { %v1151_v0 = vsel %vm1150_vm10, %v1129_v43, %v1149_v38  ;;  %1906 = vmatprep.subr.bf16.mxu0 %v1943_v49  ;;  %v1944_v43 = vld [vmem:[%s2691_s8] sm:$0xff]  }
 0x358   :  { %v1064_v36 = vadd.f32 %v1063_v53, %v1062_v40  ;;  %v1084_v61 = vrot.slane %v1083_v31, 1  ;;  %v1069_v27 = vadd.f32 %v1068_v19, %v1067_v17  ;;  %v1104_v59 = vpack.c.bf16 %v1078_v42, %v1078_v42 }
 0x35a   :  { %v1102_v45 = vpack.c.bf16 %v1064_v36, %v1064_v36  ;;  %v1085_v46 = vadd.f32 %v1084_v61, %v1083_v31  ;;  %v1070_v48 = vrot.slane %v1069_v27, 1  ;;  %v1136_v63 = vunpack.c.l.b16 %v1104_v59  ;;  %v1945_v36 = vld [vmem:[%s2695_s12 + $0x18] sm:$0xff]  }
 0x35c   :  { %v1071_v32 = vadd.f32 %v1070_v48, %v1069_v27  ;;  %v1134_v50 = vunpack.c.l.b16 %v1102_v45  ;;  %v1105_v7 = vpack.c.bf16 %v1085_v46, %v1085_v46 }
 0x35e   :  { %v1103_v23 = vpack.c.bf16 %v1071_v32, %v1071_v32  ;;  %v1155_v10 = vsel %vm1144_vm7, %v1134_v50, %v1154_v2  ;;  %v1137_v3 = vunpack.c.l.b16 %v1105_v7  ;;  %v1732_v50 = vld [vmem:[%s2697_s14] ss:$0 sm:$0xff] }
 0x360   :  { %v1135_v30 = vunpack.c.l.b16 %v1103_v23 }
 0x362   :  { %v1156_v44 = vsel %vm1146_vm8, %v1135_v30, %v1155_v10 }
 0x363   :  { %v1157_v4 = vsel %vm1148_vm9, %v1136_v63, %v1156_v44 }
 0x364   :  { %v1158_v6 = vsel %vm1150_vm10, %v1137_v3, %v1157_v4  ;;  %v2581_v4 = vld [vmem:[%s2692_s9] ss:$0 sm:$0xff] }
 0x365   :  { %v1159_v11 = vpack.c.b16 %v1158_v6, %v1151_v0 }
 0x367   :  { %1883 = vmatmul.mubr.msk.bf16.vlgmr.msra.gmra.mxu1 %vm105_vm1, %v1159_v11 }
 0x368   :  { %1902 = vmatprep.mubr.msk.bf16.mxu1 %vm2046_vm0, %v2045_v1  ;;  %1895 = vmatpush3.bf16.msra.mxu1 %v1945_v36 }
 0x369   :  { %1896 = vmatprep.subr.bf16.mxu1 %v2045_v1 }
 0x427   :  { %v1209_v14 = vpop.f32.mrf.mxu1 }
 0x428   :  { %v1216_v21 = vadd.f32 %v2021_v16, %v1209_v14 }
 0x429   :  { %v1884_v40 = vpop.f32.mrf.mxu1 }
 0x42a   :  { %v1225_v56 = vadd.f32 %v1731_v15, %v1216_v21 }
 0x42b   :  { %v1212_v17 = vpop.f32.mrf.mxu1 }
 0x42c   :  { %v1217_v18 = vadd.f32 %v2022_v22, %v1212_v17  ;;  %v1229_v12 = vsel %vm105_vm1, %v1225_v56, 0.0  ;;  %v1238_v25 = vmul.f32 %v1225_v56, %v1225_v56 }
 0x42d   :  { %1230 = vadd.xlane.f32.xlu0 %v1229_v12  ;;  %v1885_v28 = vpop.f32.mrf.mxu1 }
 0x42e   :  { %v1226_v53 = vadd.f32 %v1731_v15, %v1217_v18  ;;  %v1240_v31 = vsel %vm105_vm1, %v1238_v25, 0.0 }
 0x430   :  { %v1232_v19 = vsel %vm105_vm1, %v1226_v53, 0.0  ;;  %v1239_v33 = vmul.f32 %v1226_v53, %v1226_v53 }
 0x431   :  { %1241 = vadd.xlane.f32.xlu0 %v1240_v31  ;;  %1233 = vadd.xlane.f32.xlu1 %v1232_v19 }
 0x432   :  { %v1243_v39 = vsel %vm105_vm1, %v1239_v33, 0.0 }
 0x435   :  { %1244 = vadd.xlane.f32.xlu0 %v1243_v39 }
 0x4b6   :  { %v1231_v61 = vpop.xlane.xlu0 %1230 }
 0x4b7   :  { %v1236_v27 = vmul.f32 0.03125, %v1231_v61 }
 0x4b9   :  { %v1248_v60 = vmul.f32 %v1236_v27, %v1236_v27  ;;  %v1252_v62 = vsub.f32 %v1225_v56, %v1236_v27 }
 0x4ba   :  { %v1242_v24 = vpop.xlane.xlu0 %1241  ;;  %v1234_v35 = vpop.xlane.xlu1 %1233 }
 0x4bb   :  { %v1246_v42 = vmul.f32 0.03125, %v1242_v24  ;;  %v1237_v57 = vmul.f32 0.03125, %v1234_v35 }
 0x4bd   :  { %v1250_v45 = vsub.f32 %v1246_v42, %v1248_v60  ;;  %v1249_v26 = vmul.f32 %v1237_v57, %v1237_v57  ;;  %v1253_v52 = vsub.f32 %v1226_v53, %v1237_v57 }
 0x4be   :  { %v1245_v46 = vpop.xlane.xlu0 %1244 }
 0x4bf   :  { %v1254_v48 = vadd.f32 1e-05, %v1250_v45  ;;  %v1247_v5 = vmul.f32 0.03125, %v1245_v46 }
 0x4c1   :  { %2013 = vrsqrt.f32 %v1254_v48  ;;  %v1251_v29 = vsub.f32 %v1247_v5, %v1249_v26 }
 0x4c3   :  { %v1255_v32 = vadd.f32 1e-05, %v1251_v29 }
 0x4c5   :  { %2015 = vrsqrt.f32 %v1255_v32 }
 0x4ce   :  { %v2014_v47 = vpop.eup %2013 }
 0x4cf   :  { %v1258_v59 = vmul.f32 %v2014_v47, %v1252_v62 }
 0x4d1   :  { %v1266_v7 = vmul.f32 %v1732_v50, %v1258_v59 }
 0x4d2   :  { %v2016_v2 = vpop.eup %2015 }
 0x4d3   :  { %v1259_v23 = vmul.f32 %v2016_v2, %v1253_v52  ;;  %v2538_v38 = vadd.f32 %v1733_v37, %v1266_v7 }
 0x4d5   :  { %v1267_v30 = vmul.f32 %v1732_v50, %v1259_v23 }
 0x4d7   :  { %v2540_v63 = vadd.f32 %v1733_v37, %v1267_v30 }
 0x4d9   :  { %v1280_v10 = vpack.c.bf16 %v2540_v63, %v2538_v38 }
 0x4db   :  { %1891 = vmatmul.mubr.msk.bf16.vlgmr.msra.gmra.mxu0 %vm105_vm1, %v1280_v10 }
 0x4dc   :  { %1907 = vmatpush3.bf16.msra.mxu0 %v1943_v49  ;;  %1910 = vmatprep.mubr.msk.bf16.mxu0 %vm105_vm1, %v2221_v8  ;;  %v1946_v8 = vld [vmem:[%s2695_s12 + $0x10] sm:$0xff]  }
 0x4dd   :  { %1908 = vmatprep.subr.bf16.mxu0 %v1944_v43  ;;  %1897 = vmatpush3.bf16.msra.mxu1 %v1946_v8 }
 0x4de   :  { %1898 = vmatprep.subr.bf16.mxu1 %v2045_v1 }
 0x4e0   :  { %1909 = vmatpush3.bf16.msra.mxu0 %v1944_v43 }
 0x4e3   :  { %1911 = vmatmul.mubr.msk.bf16.vlgmr.msra.gmra.mxu0 %vm105_vm1, %v2223_v9  ;;  %v1947_v9 = vld [vmem:[%s2695_s12 + $0x8] sm:$0xff]  }
 0x4e4   :  { %1914 = vmatprep.mubr.msk.bf16.mxu0 %vm105_vm1, %v2228_v13  ;;  %1899 = vmatpush3.bf16.msra.mxu1 %v1947_v9  ;;  %v1948_v13 = vld [vmem:[%s2695_s12] sm:$0xff]  }
 0x4e5   :  { %1900 = vmatprep.subr.bf16.mxu1 %v2045_v1  ;;  %v1743_v9 = vld [vmem:[%s2696_s13] ss:$0 sm:$0xff] }
 0x4e8   :  { %1901 = vmatpush3.bf16.msra.mxu1 %v1948_v13 }
 0x4eb   :  { %1915 = vmatmul.mubr.msk.bf16.gmra.mxu0 %vm105_vm1, %v2252_v34  ;;  %v1734_v34 = vld [vmem:[%s2694_s11] ss:$0 sm:$0xff] }
 0x4ec   :  { %1918 = vmatprep.mubr.msk.bf16.mxu0 %vm105_vm1, %v2254_v20 }
 0x4f3   :  { %1919 = vmatmul.mubr.msk.bf16.gmra.mxu0 %vm105_vm1, %v2274_v51 }
 0x4f4   :  { %1922 = vmatprep.mubr.msk.bf16.mxu0 %vm105_vm1, %v2276_v54 }
 0x4fb   :  { %1923 = vmatmul.mubr.msk.bf16.gmra.mxu0 %vm105_vm1, %v2288_v58 }
 0x59b   :  { %v1337_v20 = vpop.f32.mrf.mxu0 }
 0x59c   :  { %v1338_v54 = vadd.f32 %v1734_v34, %v1337_v20 }
 0x59d   :  { %v1892_v51 = vpop.f32.mrf.mxu0 }
 0x59e   :  { %v1344_v1 = vmax.f32 %v1338_v54, 0.0 }
 0x59f   :  { %v1340_v58 = vpop.f32.mrf.mxu0 }
 0x5a0   :  { %v1341_v3 = vadd.f32 %v1734_v34, %v1340_v58 }
 0x5a1   :  { %v1893_v44 = vpop.f32.mrf.mxu0 }
 0x5a2   :  { %v1345_v0 = vmax.f32 %v1341_v3, 0.0 }
 0x5a3   :  { %v1912_v6 = vpop.f32.mrf.mxu0 }
 0x5a4   :  { %v1354_v11 = vpack.c.bf16 %v1345_v0, %v1344_v1  ;;  %v1551_v14 = vadd.f32 %v1912_v6, %v2581_v4 }
 0x5a5   :  { %v1542_v15 = vpop.f32.mrf.mxu0 }
 0x5a6   :  { %v1775_v16 = vpack.c.bf16 %v1551_v14, %v1551_v14  ;;  %v1543_v21 = vadd.f32 %v2581_v4, %v1542_v15  ;;  %1903 = vmatmul.mubr.msk.bf16.vlgmr.msra.gmra.mxu1 %vm1379_vm11, %v1354_v11 }
 0x5a7   :  { %v1913_v40 = vpop.f32.mrf.mxu0 }
 0x5a8   :  { %1672 = vst.msk [vmem:[%s2702_s19 + $0x8] sm:$0xf] %vm1669_vm12, %v1775_v16  ;;  %v1773_v56 = vpack.c.bf16 %v1543_v21, %v1543_v21  ;;  %v1554_v17 = vadd.f32 %v1913_v40, %v2581_v4 }
 0x5a9   :  { %v1545_v22 = vpop.f32.mrf.mxu0 }
 0x5aa   :  { %1670 = vst.msk [vmem:[%s2702_s19] sm:$0xf] %vm1669_vm12, %v1773_v56  ;;  %v1776_v18 = vpack.c.bf16 %v1554_v17, %v1554_v17  ;;  %v1546_v12 = vadd.f32 %v2581_v4, %v1545_v22 }
 0x5ab   :  { %v1916_v25 = vpop.f32.mrf.mxu0 }
 0x5ac   :  { %1673 = vst.msk [vmem:[%s2702_s19 + $0xc] sm:$0xf] %vm1669_vm12, %v1776_v18  ;;  %v1774_v28 = vpack.c.bf16 %v1546_v12, %v1546_v12  ;;  %v1567_v53 = vadd.f32 %v1916_v25, %v2581_v4 }
 0x5ad   :  { %v1558_v31 = vpop.f32.mrf.mxu0 }
 0x5ae   :  { %1671 = vst.msk [vmem:[%s2702_s19 + $0x4] sm:$0xf] %vm1669_vm12, %v1774_v28  ;;  %v1779_v19 = vpack.c.bf16 %v1567_v53, %v1567_v53  ;;  %v1559_v33 = vadd.f32 %v2581_v4, %v1558_v31 }
 0x5af   :  { %v1917_v39 = vpop.f32.mrf.mxu0 }
 0x5b0   :  { %1676 = vst.msk [vmem:[%s2702_s19 + $0x18] sm:$0xf] %vm1669_vm12, %v1779_v19  ;;  %v1777_v55 = vpack.c.bf16 %v1559_v33, %v1559_v33  ;;  %v1570_v41 = vadd.f32 %v1917_v39, %v2581_v4  ;;  %v1744_v19 = vld [vmem:[%s2699_s16] ss:$0 sm:$0xff]  ;;  %s2023_s16 = scalar_lea.vmem %s1692_s3, 256 }
 0x5b1   :  { %v1561_v49 = vpop.f32.mrf.mxu0  ;;  %v1745_v39 = vld [vmem:[%s2700_s17] ss:$0 sm:$0xff]  ;;  %p2024_p0 = scmp.ne.s32.totalorder %s1692_s3, %s2023_s16  ;;  %p2029_p2 = scmp.lt.s32.totalorder %s2023_s16, %s2023_s16 }
 0x5b2   :  { %1674 = vst.msk [vmem:[%s2702_s19 + $0x10] sm:$0xf] %vm1669_vm12, %v1777_v55  ;;  %v1780_v36 = vpack.c.bf16 %v1570_v41, %v1570_v41  ;;  %v1562_v61 = vadd.f32 %v2581_v4, %v1561_v49 }
 0x5b3   :  { %v1920_v27 = vpop.f32.mrf.mxu0  ;;  %p2030_p3 = por %p2029_p2, %p2028_p1 }
 0x5b4   :  { %1677 = vst.msk [vmem:[%s2702_s19 + $0x1c] sm:$0xf] %vm1669_vm12, %v1780_v36  ;;  %v1778_v24 = vpack.c.bf16 %v1562_v61, %v1562_v61  ;;  %v1583_v35 = vadd.f32 %v1920_v27, %v2581_v4 }
 0x5b5   :  { %v1574_v60 = vpop.f32.mrf.mxu0  ;;  %p2031_p4 = pnand %p2030_p3, %p2024_p0 }
 0x5b6   :  { %1675 = vst.msk [vmem:[%s2702_s19 + $0x14] sm:$0xf] %vm1669_vm12, %v1778_v24  ;;  %v1783_v42 = vpack.c.bf16 %v1583_v35, %v1583_v35  ;;  %v1575_v57 = vadd.f32 %v2581_v4, %v1574_v60 }
 0x5b7   :  { %v1921_v45 = vpop.f32.mrf.mxu0 }
 0x5b8   :  { %1680 = vst.msk [vmem:[%s2702_s19 + $0x28] sm:$0xf] %vm1669_vm12, %v1783_v42  ;;  %v1781_v46 = vpack.c.bf16 %v1575_v57, %v1575_v57  ;;  %v1586_v48 = vadd.f32 %v1921_v45, %v2581_v4 }
 0x5b9   :  { %v1577_v26 = vpop.f32.mrf.mxu0 }
 0x5ba   :  { %1678 = vst.msk [vmem:[%s2702_s19 + $0x20] sm:$0xf] %vm1669_vm12, %v1781_v46  ;;  %v1784_v5 = vpack.c.bf16 %v1586_v48, %v1586_v48  ;;  %v1578_v29 = vadd.f32 %v2581_v4, %v1577_v26 }
 0x5bb   :  { %v1924_v32 = vpop.f32.mrf.mxu0 }
 0x5bc   :  { %1681 = vst.msk [vmem:[%s2702_s19 + $0x2c] sm:$0xf] %vm1669_vm12, %v1784_v5  ;;  %v1782_v62 = vpack.c.bf16 %v1578_v29, %v1578_v29  ;;  %v1599_v47 = vadd.f32 %v1924_v32, %v2581_v4 }
 0x5bd   :  { %v1590_v59 = vpop.f32.mrf.mxu0 }
 0x5be   :  { %1679 = vst.msk [vmem:[%s2702_s19 + $0x24] sm:$0xf] %vm1669_vm12, %v1782_v62  ;;  %v1787_v50 = vpack.c.bf16 %v1599_v47, %v1599_v47  ;;  %v1591_v52 = vadd.f32 %v2581_v4, %v1590_v59 }
 0x5bf   :  { %v1925_v2 = vpop.f32.mrf.mxu0 }
 0x5c0   :  { %1684 = vst.msk [vmem:[%s2702_s19 + $0x38] sm:$0xf] %vm1669_vm12, %v1787_v50  ;;  %v1785_v7 = vpack.c.bf16 %v1591_v52, %v1591_v52  ;;  %v1602_v23 = vadd.f32 %v1925_v2, %v2581_v4 }
 0x5c1   :  { %v1593_v37 = vpop.f32.mrf.mxu0 }
 0x5c2   :  { %1682 = vst.msk [vmem:[%s2702_s19 + $0x30] sm:$0xf] %vm1669_vm12, %v1785_v7  ;;  %v1788_v30 = vpack.c.bf16 %v1602_v23, %v1602_v23  ;;  %v1594_v10 = vadd.f32 %v2581_v4, %v1593_v37 }
 0x5c4   :  { %1685 = vst.msk [vmem:[%s2702_s19 + $0x3c] sm:$0xf] %vm1669_vm12, %v1788_v30  ;;  %v1786_v43 = vpack.c.bf16 %v1594_v10, %v1594_v10 }
 0x5c6   :  { %1683 = vst.msk [vmem:[%s2702_s19 + $0x34] sm:$0xf] %vm1669_vm12, %v1786_v43 }
 0x666   :  { %v1417_v8 = vpop.f32.mrf.mxu1 }
 0x667   :  { %v1424_v13 = vadd.f32 %v1417_v8, %v2538_v38 }
 0x668   :  { %v1904_v34 = vpop.f32.mrf.mxu1 }
 0x669   :  { %v1433_v20 = vadd.f32 %v1743_v9, %v1424_v13 }
 0x66a   :  { %v1420_v51 = vpop.f32.mrf.mxu1 }
 0x66b   :  { %v1425_v54 = vadd.f32 %v1420_v51, %v2540_v63  ;;  %v1437_v58 = vsel %vm105_vm1, %v1433_v20, 0.0  ;;  %v1445_v3 = vmul.f32 %v1433_v20, %v1433_v20 }
 0x66c   :  { %1438 = vadd.xlane.f32.xlu1 %v1437_v58  ;;  %v1905_v44 = vpop.f32.mrf.mxu1 }
 0x66d   :  { %v1434_v4 = vadd.f32 %v1743_v9, %v1425_v54  ;;  %v1447_v1 = vsel %vm105_vm1, %v1445_v3, 0.0 }
 0x66f   :  { %v1440_v0 = vsel %vm105_vm1, %v1434_v4, 0.0  ;;  %v1446_v6 = vmul.f32 %v1434_v4, %v1434_v4 }
 0x670   :  { %1448 = vadd.xlane.f32.xlu1 %v1447_v1  ;;  %1441 = vadd.xlane.f32.xlu0 %v1440_v0 }
 0x671   :  { %v1450_v38 = vsel %vm105_vm1, %v1446_v6, 0.0 }
 0x674   :  { %1451 = vadd.xlane.f32.xlu0 %v1450_v38 }
 0x6f5   :  { %v1439_v11 = vpop.xlane.xlu1 %1438 }
 0x6f6   :  { %v1443_v14 = vmul.f32 0.03125, %v1439_v11 }
 0x6f8   :  { %v1455_v16 = vmul.f32 %v1443_v14, %v1443_v14  ;;  %v1459_v53 = vsub.f32 %v1433_v20, %v1443_v14 }
 0x6f9   :  { %v1449_v15 = vpop.xlane.xlu1 %1448  ;;  %v1442_v63 = vpop.xlane.xlu0 %1441 }
 0x6fa   :  { %v1453_v21 = vmul.f32 0.03125, %v1449_v15  ;;  %v1444_v40 = vmul.f32 0.03125, %v1442_v63 }
 0x6fc   :  { %v1457_v56 = vsub.f32 %v1453_v21, %v1455_v16  ;;  %v1456_v18 = vmul.f32 %v1444_v40, %v1444_v40  ;;  %v1460_v55 = vsub.f32 %v1434_v4, %v1444_v40 }
 0x6fd   :  { %v1452_v17 = vpop.xlane.xlu0 %1451 }
 0x6fe   :  { %v1461_v22 = vadd.f32 1e-05, %v1457_v56  ;;  %v1454_v12 = vmul.f32 0.03125, %v1452_v17 }
 0x700   :  { %2017 = vrsqrt.f32 %v1461_v22  ;;  %v1458_v25 = vsub.f32 %v1454_v12, %v1456_v18 }
 0x702   :  { %v1462_v28 = vadd.f32 1e-05, %v1458_v25 }
 0x704   :  { %2019 = vrsqrt.f32 %v1462_v28 }
 0x70d   :  { %v2018_v31 = vpop.eup %2017 }
 0x70e   :  { %v1465_v33 = vmul.f32 %v2018_v31, %v1459_v53 }
 0x710   :  { %v1473_v41 = vmul.f32 %v1744_v19, %v1465_v33 }
 0x711   :  { %v2020_v49 = vpop.eup %2019 }
 0x712   :  { %v1466_v36 = vmul.f32 %v2020_v49, %v1460_v55  ;;  %v1481_v61 = vadd.f32 %v1745_v39, %v1473_v41 }
 0x714   :  { %v1474_v27 = vmul.f32 %v1744_v19, %v1466_v36  ;;  %1483 = vst.msk [vmem:[#allocation2] sm:$0xff] %vm105_vm1, %v1481_v61 }
 0x716   :  { %v1482_v24 = vadd.f32 %v1745_v39, %v1474_v27 }
 0x718   :  { %1484 = vst.msk [vmem:[#allocation2 + $0x8] sm:$0xff] %vm105_vm1, %v1482_v24 }
 0x719   :  { %2034 = shalt.err (!%p2031_p4)
}
 0x71a   :  { %s2051_s17 = smov 128   ;;  %s2052_s5 = smov 8  }
 0x71b   :  { %1697 = dma.vmem_to_hbm [thread:$0]  %s1692_s3, 256, %s2701_s18, [#allocation3], %s2051_s17, %s2051_s17, %s2052_s5  }
 0x71c   :  { %2043 = dma.done.wait [#allocation3], 256  }
 0x71d   :  { %2044 = vsyncadd [#allocation3], 4294967040 }
 0x71e   :  { %1705 = vsyncpa [#allocation3], 1 }

</bundles_post_ra>
